<compile_context>
chip_gen: v7x
topology: tpu7x:2x2x1
jax: 0.10.0
libtpu: 0.0.40
codegen_flags: <defaults>
</compile_context>

<pallas_src>
import functools

import jax
import jax.numpy as jnp
from jax.experimental import pallas as pl
from jax.experimental.pallas import tpu as pltpu


def _geglu_kernel(x_ref, w_ref, b_ref, o_ref, *, c_out):
    # x_ref: (C_in, t_hw)     spatial-column tile of one batch element (lane = HW)
    # w_ref: (2*C_out, C_in)  fused [hidden; gate] weights (resident across grid)
    # b_ref: (2*C_out, 1)     fused bias, f32 (resident)
    # o_ref: (C_out, t_hw)
    x = x_ref[...]
    # One fused MXU matmul, f32 accumulation.
    acc = jnp.dot(w_ref[...], x, preferred_element_type=jnp.float32)
    # Add bias after slicing: avoids broadcasting b over the full
    # (2*C_out, t_hw) tensor and trims the f32 live footprint in the epilogue.
    h = acc[:c_out, :] + b_ref[:c_out, :]
    g = acc[c_out:, :] + b_ref[c_out:, :]
    # Exact (erf-based) GELU, matching torch.nn.functional.gelu default.
    # TODO(synk): on v5e, if the bundle dump shows the VALU slot saturating,
    # switch to the tanh approximation so the transcendental goes to the EUP.
    g = 0.5 * g * (1.0 + jax.lax.erf(g * jnp.float32(0.7071067811865476)))
    o_ref[...] = (h * g).astype(o_ref.dtype)


def _pick_tile_hw(hw, batch, c_in, c_out, itemsize, vmem_budget_bytes):
    """Largest 128-aligned spatial tile fitting the pipeline VMEM budget."""
    # Per spatial lane: double-buffered input + output tiles, plus ~2x f32
    # intermediates (acc / h / g) for the epilogue.
    per_lane = 2 * (c_in + c_out) * itemsize + 4 * (2 * c_out) * 4
    t = max(vmem_budget_bytes // per_lane, 128)
    t = (t // 128) * 128
    if t >= hw:
        t = hw
    # v7x megacore: keep >= 2 total grid steps so both TensorCores get work.
    if batch * pl.cdiv(hw, t) < 2 and hw > 128:
        half = -(-hw // 2)
        t = min(max(((half + 127) // 128) * 128, 128), hw)
    return t


@functools.partial(jax.jit,
                   static_argnames=("tile_hw", "compute_dtype", "out_dtype"))
def qc_geglu(x_nchw, w_fused, b_fused, *, tile_hw=None,
             compute_dtype=None, out_dtype=None):
    """GEGLU via two fused 1x1 convs, computed in native NCHW layout.

    x_nchw : (B, C_in, H, W)
    w_fused: (2*C_out, C_in)   rows [:C_out] = hidden_proj, [C_out:] = gate_proj
    b_fused: (2*C_out,)
    Returns (B, C_out, H, W) with dtype `out_dtype` (defaults to x's dtype).
    """
    B, C_in, H, W = x_nchw.shape
    two_cout = w_fused.shape[0]
    C_out = two_cout // 2
    HW = H * W

    if out_dtype is None:
        out_dtype = x_nchw.dtype   # explicit: bf16 compute never leaks into output dtype
    if compute_dtype is not None:
        # bf16 activations/weights halve HBM traffic; MXU accumulation stays f32.
        x_nchw = x_nchw.astype(compute_dtype)
        w_fused = w_fused.astype(compute_dtype)

    x3d = x_nchw.reshape(B, C_in, HW)                 # free reshape, no transpose
    b2d = b_fused.astype(jnp.float32).reshape(two_cout, 1)

    itemsize = jnp.dtype(x_nchw.dtype).itemsize
    VMEM_LIMIT = 32 * 1024 * 1024   # safe on v5e/v6e (128 MiB phys) and v7x (64 MiB phys)

    if tile_hw is None:
        t_hw = _pick_tile_hw(HW, B, C_in, C_out, itemsize,
                             vmem_budget_bytes=VMEM_LIMIT // 2)
    else:
        t_hw = min(tile_hw, HW)
        if t_hw < HW:
            t_hw = max((t_hw // 128) * 128, 128)

    grid = (B, pl.cdiv(HW, t_hw))

    # Advisory cost estimate: matmul FLOPs + pointwise epilogue, erf count,
    # and the dominant HBM traffic (x read + out write + resident weights).
    flops = 2 * B * HW * two_cout * C_in + 8 * B * HW * C_out
    bytes_accessed = (B * (C_in + C_out) * HW) * itemsize \
                     + two_cout * C_in * itemsize + two_cout * 4
    cost = pl.CostEstimate(flops=flops,
                           transcendentals=B * HW * C_out,
                           bytes_accessed=bytes_accessed)

    out3d = pl.pallas_call(
        functools.partial(_geglu_kernel, c_out=C_out),
        out_shape=jax.ShapeDtypeStruct((B, C_out, HW), out_dtype),
        grid=grid,
        in_specs=[
            # activation tile: batch dim squeezed, lane axis = spatial (128-aligned)
            pl.BlockSpec((None, C_in, t_hw), lambda b, j: (b, 0, j)),
            # fused weight, resident across the whole grid (constant index_map)
            pl.BlockSpec((two_cout, C_in), lambda b, j: (0, 0)),
            # fused bias, resident
            pl.BlockSpec((two_cout, 1), lambda b, j: (0, 0)),
        ],
        out_specs=pl.BlockSpec((None, C_out, t_hw), lambda b, j: (b, 0, j)),
        compiler_params=pltpu.CompilerParams(
            dimension_semantics=("parallel", "parallel"),
            vmem_limit_bytes=VMEM_LIMIT,
        ),
        cost_estimate=cost,
    )(x3d, w_fused, b2d)

    return out3d.reshape(B, C_out, H, W)


def _reference(x_nchw, w_fused, b_fused):
    B, C_in, H, W = x_nchw.shape
    C_out = w_fused.shape[0] // 2
    x2d = jnp.transpose(x_nchw, (0, 2, 3, 1)).reshape(-1, C_in)
    proj = x2d @ w_fused.T + b_fused
    h = proj[:, :C_out]
    g = jax.nn.gelu(proj[:, C_out:], approximate=False)
    out = h * g
    return jnp.transpose(out.reshape(B, H, W, C_out), (0, 3, 1, 2))


if __name__ == "__main__":
    # Shapes implied by the module: dim_in channels in, dim_out channels out;
    # the original GEGLU Linear is (dim_in -> 2*dim_out), split hidden/gate.
    B, C_in, H, W = 2, 32, 32, 32
    dim_out = 64

    key = jax.random.PRNGKey(0)
    kx, kw, kb = jax.random.split(key, 3)

    x = jax.random.normal(kx, (B, C_in, H, W), dtype=jnp.float32)

    # Fused "checkpoint": one linear weight (2*dim_out, dim_in) + bias, exactly
    # as QcGEGLU.__init__ splits it (rows [:dim_out] = hidden, [dim_out:] = gate).
    w_fused = jax.random.normal(kw, (2 * dim_out, C_in), dtype=jnp.float32) * 0.05
    b_fused = jax.random.normal(kb, (2 * dim_out,), dtype=jnp.float32) * 0.05

    ref = _reference(x, w_fused, b_fused)

    # f32 path: bit-for-bit-level match to the torch exact-GELU reference.
    out = qc_geglu(x, w_fused, b_fused)
    out = jax.block_until_ready(out)
    assert out.shape == (B, dim_out, H, W)
    assert out.dtype == jnp.float32
    assert jnp.allclose(out, ref, atol=1e-4, rtol=1e-4), float(
        jnp.max(jnp.abs(out - ref))
    )

    # bf16 compute path (halves HBM traffic) with explicit f32 output dtype.
    out_bf16 = qc_geglu(x, w_fused, b_fused,
                        compute_dtype=jnp.bfloat16, out_dtype=jnp.float32)
    out_bf16 = jax.block_until_ready(out_bf16)
    assert out_bf16.dtype == jnp.float32
    assert jnp.allclose(out_bf16, ref, atol=5e-2, rtol=5e-2), float(
        jnp.max(jnp.abs(out_bf16 - ref))
    )

    print("KERNEL_OK")
</pallas_src>

<mosaic_0001>
module attributes {stable_mosaic.version = 11 : i64} {
  func.func @_geglu_kernel(%arg0: i32, %arg1: i32, %arg2: memref<1x32x1024xf32, #tpu.memory_space<vmem>>, %arg3: memref<128x32xf32, #tpu.memory_space<vmem>>, %arg4: memref<128x1xf32, #tpu.memory_space<vmem>>, %arg5: memref<1x64x1024xf32, #tpu.memory_space<vmem>>) attributes {dimension_semantics = [#tpu.dimension_semantics<parallel>, #tpu.dimension_semantics<parallel>], iteration_bounds = array<i64: 2, 1>, scalar_prefetch = 0 : i64, scratch_operands = 0 : i64, tpu.core_type = #tpu.core_type<tc>, window_params = [{transform_indices = @transform_0, window_bounds = array<i64: 1, 32, 1024>}, {pipeline_mode = #tpu.pipeline_mode<synchronous>, transform_indices = @transform_1, window_bounds = array<i64: 128, 32>}, {pipeline_mode = #tpu.pipeline_mode<synchronous>, transform_indices = @transform_2, window_bounds = array<i64: 128, 1>}, {transform_indices = @transform_3, window_bounds = array<i64: 1, 64, 1024>}]} {
    %c0 = arith.constant 0 : index
    %c0_0 = arith.constant 0 : index
    %c0_1 = arith.constant 0 : index
    %0 = vector.load %arg2[%c0, %c0_0, %c0_1] : memref<1x32x1024xf32, #tpu.memory_space<vmem>>, vector<1x32x1024xf32>
    %1 = vector.shape_cast %0 : vector<1x32x1024xf32> to vector<32x1024xf32>
    %c0_2 = arith.constant 0 : index
    %c0_3 = arith.constant 0 : index
    %2 = vector.load %arg3[%c0_2, %c0_3] : memref<128x32xf32, #tpu.memory_space<vmem>>, vector<128x32xf32>
    %cst = arith.constant dense<0.000000e+00> : vector<128x1024xf32>
    %3 = tpu.matmul %2, %1, %cst {dimension_numbers = #tpu.dot_dimension_numbers<[1], [0], [0], [1], [0, 0, 1, 1], [], []>} : vector<128x32xf32>, vector<32x1024xf32>, vector<128x1024xf32> -> vector<128x1024xf32>
    %4 = vector.extract_strided_slice %3 {offsets = [0, 0], sizes = [64, 1024], strides = [1, 1]} : vector<128x1024xf32> to vector<64x1024xf32>
    %c0_4 = arith.constant 0 : index
    %c0_5 = arith.constant 0 : index
    %5 = vector.load %arg4[%c0_4, %c0_5] : memref<128x1xf32, #tpu.memory_space<vmem>>, vector<64x1xf32>
    %6 = vector.broadcast %5 : vector<64x1xf32> to vector<64x1024xf32>
    %7 = arith.addf %4, %6 : vector<64x1024xf32>
    %8 = vector.extract_strided_slice %3 {offsets = [64, 0], sizes = [64, 1024], strides = [1, 1]} : vector<128x1024xf32> to vector<64x1024xf32>
    %c64 = arith.constant 64 : index
    %c0_6 = arith.constant 0 : index
    %9 = vector.load %arg4[%c64, %c0_6] : memref<128x1xf32, #tpu.memory_space<vmem>>, vector<64x1xf32>
    %10 = vector.broadcast %9 : vector<64x1xf32> to vector<64x1024xf32>
    %11 = arith.addf %8, %10 : vector<64x1024xf32>
    %cst_7 = arith.constant 5.000000e-01 : f32
    %12 = vector.broadcast %cst_7 : f32 to vector<64x1024xf32>
    %13 = arith.mulf %12, %11 : vector<64x1024xf32>
    %cst_8 = arith.constant 0.707106769 : f32
    %14 = vector.broadcast %cst_8 : f32 to vector<64x1024xf32>
    %15 = arith.mulf %11, %14 : vector<64x1024xf32>
    %16 = math.erf %15 : vector<64x1024xf32>
    %cst_9 = arith.constant 1.000000e+00 : f32
    %17 = vector.broadcast %cst_9 : f32 to vector<64x1024xf32>
    %18 = arith.addf %17, %16 : vector<64x1024xf32>
    %19 = arith.mulf %13, %18 : vector<64x1024xf32>
    %20 = arith.mulf %7, %19 : vector<64x1024xf32>
    %c0_10 = arith.constant 0 : index
    %c0_11 = arith.constant 0 : index
    %c0_12 = arith.constant 0 : index
    %21 = vector.load %arg5[%c0_10, %c0_11, %c0_12] : memref<1x64x1024xf32, #tpu.memory_space<vmem>>, vector<1x64x1024xf32>
    %22 = vector.shape_cast %21 : vector<1x64x1024xf32> to vector<64x1024xf32>
    %23 = vector.shape_cast %20 : vector<64x1024xf32> to vector<1x64x1024xf32>
    tpu.vector_store %arg5[%c0_10, %c0_11, %c0_12], %23 {strides = array<i32>} : memref<1x64x1024xf32, #tpu.memory_space<vmem>>, vector<1x64x1024xf32>,
    return
  }
  func.func @transform_0(%arg0: i32, %arg1: i32) -> (i32, i32, i32) {
    %c0_i32 = arith.constant 0 : i32
    %c0_i32_0 = arith.constant 0 : i32
    return %arg0, %c0_i32, %arg1 : i32, i32, i32
  }
  func.func @transform_1(%arg0: i32, %arg1: i32) -> (i32, i32) {
    %c0_i32 = arith.constant 0 : i32
    %c0_i32_0 = arith.constant 0 : i32
    %c0_i32_1 = arith.constant 0 : i32
    return %c0_i32, %c0_i32_0 : i32, i32
  }
  func.func @transform_2(%arg0: i32, %arg1: i32) -> (i32, i32) {
    %c0_i32 = arith.constant 0 : i32
    %c0_i32_0 = arith.constant 0 : i32
    %c0_i32_1 = arith.constant 0 : i32
    return %c0_i32, %c0_i32_0 : i32, i32
  }
  func.func @transform_3(%arg0: i32, %arg1: i32) -> (i32, i32, i32) {
    %c0_i32 = arith.constant 0 : i32
    %c0_i32_0 = arith.constant 0 : i32
    return %arg0, %c0_i32, %arg1 : i32, i32, i32
  }
}

</mosaic_0001>

<bundles_post_ra>
// kernel: qc_geglu.1
= control target key start
LH: loop header
LB: loop body
LE: loop exit
PB: predicated region body
PF: predicated region fallthrough
CT: control target
= control target key end

     0   :  { %s2021_s12 = smov 0   ;;  %s2023_s13 = smov 0   ;;  %s3179_s0 = inlined_call_operand.vmem [shape: f32[2,32,1024], index: 0, kind: input, shape index: {}]   ;;  %s3180_s1 = inlined_call_operand.vmem [shape: f32[128,32], index: 1, kind: input, shape index: {}]   ;;  %s3181_s2 = inlined_call_operand.vmem [shape: f32[128,1], index: 2, kind: input, shape index: {}]   ;;  %s3182_s3 = inlined_call_operand.vmem [shape: f32[2,64,1024], index: 3, kind: output, shape index: {}]  }
   0x1   :  { %s2025_s14 = smov 0  }
   0x2 LB: > { %s25_s15 = sadd.s32 1, %s1993_s13  ;;  %p1714_p0 = scmp.ge.s32.totalorder %s1997_s14, 1  ;;  %s1997_s14 = sphi %s2025_s14, %s13_s14   ;;  %s1993_s13 = sphi %s2023_s13, %s3266_s13   ;;  %s1989_s12 = sphi %s2021_s12, %s3265_s12  }
   0x3   : > { %p27_p1 = scmp.ge.s32.totalorder %s25_s15, 2  ;;  %p158_p2 = scmp.lt.s32.totalorder %s1997_s14, 3 }
   0x5   : > { %s3268_s15 = smov (%p27_p1, %s25_s15), 0  ;;  %p159_p3 = pnand %p1714_p0, %p158_p2 }
   0x7   : > { %162 = sbr.rel (%p159_p3) target bundleno = 409 (0x199), region = 32 }
   0xe   : > { %p191_p4 = scmp.lt.s32.totalorder %s1989_s12, 1  ;;  %v1999_v0 = vmov 0.0   ;;  %v2000_v1 = vmov 0   ;;  %v1063_v2 = vld [vmem:[%s3181_s2 + $0x40] sm:$0xff]  ;;  %v1065_v3 = vld [vmem:[%s3181_s2 + $0x50] sm:$0xff]  ;;  %vm258_vm0 = vcmask 261120  }
   0xf   : > { %371 = vmatprep.mubr.f32.mxu0 %v1999_v0  ;;  %532 = vmatprep.mubr.f32.mxu1 %v1999_v0  ;;  %v2076_v30 = vld [vmem:[%s3180_s1] sm:$0xff]  ;;  %v1064_v48 = vld [vmem:[%s3181_s2 + $0x48] sm:$0xff]  ;;  %v1066_v55 = vld [vmem:[%s3181_s2 + $0x58] sm:$0xff] }
  0x10   : > { %s3270_s12 = smov (!%p191_p4, %s1989_s12), 1  ;;  %1845 = vset.pattern.permute.xlu0 %v2000_v1  ;;  %1846 = vset.pattern.permute.xlu1 %v2000_v1  ;;  %v2102_v52 = vld [vmem:[%s3180_s1 + $0x8] sm:$0xff]  ;;  %v2117_v56 = vld [vmem:[%s3180_s1 + $0x10] sm:$0xff]  ;;  %v1067_v57 = vld [vmem:[%s3181_s2 + $0x60] sm:$0xff] }
  0x11   : > { %s1785_s16 = sshll.u32 %s3270_s12, 8  ;;  %1073 = vperm.xlu0 %1845, %v1063_v2   ;;  %1083 = vperm.xlu1 %1846, %v1065_v3   ;;  %v1068_v58 = vld [vmem:[%s3181_s2 + $0x68] sm:$0xff]  ;;  %v2134_v59 = vld [vmem:[%s3180_s1 + $0x18] sm:$0xff]  ;;  %v1069_v60 = vld [vmem:[%s3181_s2 + $0x70] sm:$0xff]  ;;  %s1786_s11 = sshll.u32 %s3270_s12, 9 }
  0x12   : > { %s2047_s19 = scalar_lea.vmem %s3179_s0, %s1785_s16  ;;  %v1070_v61 = vld [vmem:[%s3181_s2 + $0x78] sm:$0xff]  ;;  %v2151_v62 = vld [vmem:[%s3180_s1 + $0x20] sm:$0xff]  ;;  %v952_v1 = vld [vmem:[%s3181_s2 + $0x8] sm:$0xff]  ;;  %s2554_s17 = scalar_lea.vmem %s3182_s3, %s1786_s11 }
  0x13   : > { %v211_v4 = vld [vmem:[%s2047_s19 + $0x8] sm:$0xff]  ;;  %v213_v6 = vld [vmem:[%s2047_s19 + $0x18] sm:$0xff]  ;;  %v210_v9 = vld [vmem:[%s2047_s19] sm:$0xff] }
  0x14   : > { %v219_v5 = vld [vmem:[%s2047_s19 + $0x48] sm:$0xff]  ;;  %v221_v8 = vld [vmem:[%s2047_s19 + $0x58] sm:$0xff]  ;;  %v218_v10 = vld [vmem:[%s2047_s19 + $0x40] sm:$0xff] }
  0x15   : > { %v1787_v7 = vpack.c.bf16 %v219_v5, %v211_v4  ;;  %v1795_v11 = vpack.c.bf16 %v221_v8, %v213_v6  ;;  %v1789_v12 = vpack.c.bf16 %v218_v10, %v210_v9  ;;  %v212_v13 = vld [vmem:[%s2047_s19 + $0x10] sm:$0xff]  ;;  %v227_v15 = vld [vmem:[%s2047_s19 + $0x88] sm:$0xff]  ;;  %v229_v18 = vld [vmem:[%s2047_s19 + $0x98] sm:$0xff]  ;;  %1078 = vperm.xlu0 %1845, %v1064_v48   ;;  %1088 = vperm.xlu1 %1846, %v1066_v55  }
  0x16   : > { %v220_v14 = vld [vmem:[%s2047_s19 + $0x50] sm:$0xff]  ;;  %v235_v17 = vld [vmem:[%s2047_s19 + $0xc8] sm:$0xff]  ;;  %v237_v19 = vld [vmem:[%s2047_s19 + $0xd8] sm:$0xff] }
  0x17   : > { %1788 = vmatprep.subr.bf16.mxu0 %v1787_v7  ;;  %v1797_v16 = vpack.c.bf16 %v220_v14, %v212_v13  ;;  %1796 = vmatprep.subr.bf16.mxu1 %v1795_v11  ;;  %v1791_v20 = vpack.c.bf16 %v235_v17, %v227_v15  ;;  %v1799_v21 = vpack.c.bf16 %v237_v19, %v229_v18  ;;  %v226_v22 = vld [vmem:[%s2047_s19 + $0x80] sm:$0xff]  ;;  %v228_v24 = vld [vmem:[%s2047_s19 + $0x90] sm:$0xff]  ;;  %v215_v27 = vld [vmem:[%s2047_s19 + $0x28] sm:$0xff] }
  0x18   : > { %1790 = vmatpush1.bf16.msra.mxu0 %v1789_v12  ;;  %v234_v23 = vld [vmem:[%s2047_s19 + $0xc0] sm:$0xff]  ;;  %v236_v26 = vld [vmem:[%s2047_s19 + $0xd0] sm:$0xff]  ;;  %v223_v28 = vld [vmem:[%s2047_s19 + $0x68] sm:$0xff] }
  0x19   : > { %1798 = vmatpush1.bf16.msra.mxu1 %v1797_v16  ;;  %v1793_v25 = vpack.c.bf16 %v234_v23, %v226_v22  ;;  %1792 = vmatprep.subr.bf16.mxu0 %v1791_v20  ;;  %v1801_v29 = vpack.c.bf16 %v236_v26, %v228_v24  ;;  %v1803_v31 = vpack.c.bf16 %v223_v28, %v215_v27  ;;  %v217_v32 = vld [vmem:[%s2047_s19 + $0x38] sm:$0xff]  ;;  %v214_v34 = vld [vmem:[%s2047_s19 + $0x20] sm:$0xff]  ;;  %v216_v37 = vld [vmem:[%s2047_s19 + $0x30] sm:$0xff] }
  0x1a   : > { %1800 = vmatprep.subr.bf16.mxu1 %v1799_v21  ;;  %v225_v33 = vld [vmem:[%s2047_s19 + $0x78] sm:$0xff]  ;;  %v222_v36 = vld [vmem:[%s2047_s19 + $0x60] sm:$0xff]  ;;  %v224_v38 = vld [vmem:[%s2047_s19 + $0x70] sm:$0xff]  ;;  %1093 = vperm.xlu0 %1845, %v1067_v57  }
  0x1b   : > { %v1811_v35 = vpack.c.bf16 %v225_v33, %v217_v32  ;;  %v1805_v39 = vpack.c.bf16 %v222_v36, %v214_v34  ;;  %v231_v40 = vld [vmem:[%s2047_s19 + $0xa8] sm:$0xff]  ;;  %v233_v42 = vld [vmem:[%s2047_s19 + $0xb8] sm:$0xff]  ;;  %v1813_v43 = vpack.c.bf16 %v224_v38, %v216_v37  ;;  %v230_v46 = vld [vmem:[%s2047_s19 + $0xa0] sm:$0xff]  ;;  %1098 = vperm.xlu1 %1846, %v1068_v58  }
  0x1c   : > { %1794 = vmatpush1.bf16.msra.mxu0 %v1793_v25  ;;  %v239_v41 = vld [vmem:[%s2047_s19 + $0xe8] sm:$0xff]  ;;  %v241_v44 = vld [vmem:[%s2047_s19 + $0xf8] sm:$0xff]  ;;  %v238_v47 = vld [vmem:[%s2047_s19 + $0xe0] sm:$0xff] }
  0x1d   : > { %1802 = vmatpush1.bf16.msra.mxu1 %v1801_v29  ;;  %1804 = vmatprep.subr.bf16.mxu0 %v1803_v31  ;;  %v1807_v45 = vpack.c.bf16 %v239_v41, %v231_v40  ;;  %v1815_v49 = vpack.c.bf16 %v241_v44, %v233_v42  ;;  %v232_v50 = vld [vmem:[%s2047_s19 + $0xb0] sm:$0xff]  ;;  %v1809_v53 = vpack.c.bf16 %v238_v47, %v230_v46  ;;  %v951_v63 = vld [vmem:[%s3181_s2] sm:$0xff]  ;;  %v2168_v2 = vld [vmem:[%s3180_s1 + $0x28] sm:$0xff] }
  0x1e   : > { %1812 = vmatprep.subr.bf16.mxu1 %v1811_v35  ;;  %v240_v51 = vld [vmem:[%s2047_s19 + $0xf0] sm:$0xff]  ;;  %1103 = vperm.xlu0 %1845, %v1069_v60   ;;  %v954_v4 = vld [vmem:[%s3181_s2 + $0x18] sm:$0xff]  ;;  %v955_v6 = vld [vmem:[%s3181_s2 + $0x20] sm:$0xff] }
  0x1f   : > { %1719 = vmatmul.mubr.msk.f32.vlgmr.msra.gmra.mrb[0].mxu0 %vm258_vm0, %v2076_v30  ;;  %v1817_v54 = vpack.c.bf16 %v240_v51, %v232_v50  ;;  %1108 = vperm.xlu1 %1846, %v1070_v61   ;;  %v953_v3 = vld [vmem:[%s3181_s2 + $0x10] sm:$0xff]  ;;  %v956_v7 = vld [vmem:[%s3181_s2 + $0x28] sm:$0xff]  ;;  %v2202_v8 = vld [vmem:[%s3180_s1 + $0x38] sm:$0xff] }
  0x20   : > { %1735 = vmatmul.mubr.msk.f32.vlgmr.msra.gmra.mrb[0].mxu1 %vm258_vm0, %v2076_v30  ;;  %1806 = vmatpush1.bf16.msra.mxu0 %v1805_v39  ;;  %v2185_v5 = vld [vmem:[%s3180_s1 + $0x30] sm:$0xff]  ;;  %v958_v10 = vld [vmem:[%s3181_s2 + $0x38] sm:$0xff]  ;;  %v2219_v11 = vld [vmem:[%s3180_s1 + $0x40] sm:$0xff] }
  0x21   : > { %1814 = vmatpush1.bf16.msra.mxu1 %v1813_v43  ;;  %377 = vmatprep.mubr.f32.mxu0 %v1999_v0  ;;  %v957_v9 = vld [vmem:[%s3181_s2 + $0x30] sm:$0xff]  ;;  %v2230_v12 = vld [vmem:[%s3180_s1 + $0x48] sm:$0xff]  ;;  %v2252_v14 = vld [vmem:[%s3180_s1 + $0x58] sm:$0xff] }
  0x22   : > { %538 = vmatprep.mubr.f32.mxu1 %v1999_v0  ;;  %1808 = vmatprep.subr.bf16.mxu0 %v1807_v45  ;;  %v2241_v13 = vld [vmem:[%s3180_s1 + $0x50] sm:$0xff]  ;;  %v2263_v15 = vld [vmem:[%s3180_s1 + $0x60] sm:$0xff]  ;;  %v2274_v16 = vld [vmem:[%s3180_s1 + $0x68] sm:$0xff] }
  0x23   : > { %1720 = vmatmul.mubr.msk.f32.gmra.mrb[2].mxu0 %vm258_vm0, %v2102_v52  ;;  %1816 = vmatprep.subr.bf16.mxu1 %v1815_v49  ;;  %v2285_v17 = vld [vmem:[%s3180_s1 + $0x70] sm:$0xff]  ;;  %v2296_v18 = vld [vmem:[%s3180_s1 + $0x78] sm:$0xff] }
  0x24   : > { %1736 = vmatmul.mubr.msk.f32.gmra.mrb[2].mxu1 %vm258_vm0, %v2102_v52  ;;  %383 = vmatprep.mubr.f32.mxu0 %v1999_v0 }
  0x25   : > { %544 = vmatprep.mubr.f32.mxu1 %v1999_v0  ;;  %1810 = vmatpush1.bf16.msra.mxu0 %v1809_v53 }
  0x26   : > { %1818 = vmatpush1.bf16.msra.mxu1 %v1817_v54  ;;  %961 = vperm.xlu0 %1845, %v951_v63  }
  0x27   : > { %1721 = vmatmul.mubr.msk.f32.gmra.mrb[4].mxu0 %vm258_vm0, %v2117_v56  ;;  %966 = vperm.xlu1 %1846, %v952_v1  }
  0x28   : > { %1737 = vmatmul.mubr.msk.f32.gmra.mrb[4].mxu1 %vm258_vm0, %v2117_v56  ;;  %389 = vmatprep.mubr.f32.mxu0 %v1999_v0 }
  0x29   : > { %550 = vmatprep.mubr.f32.mxu1 %v1999_v0 }
  0x2a   : > { %971 = vperm.xlu0 %1845, %v953_v3  }
  0x2b   : > { %1722 = vmatmul.mubr.msk.f32.gmra.mrb[6].mxu0 %vm258_vm0, %v2134_v59  ;;  %976 = vperm.xlu1 %1846, %v954_v4  }
  0x2c   : > { %1738 = vmatmul.mubr.msk.f32.gmra.mrb[6].mxu1 %vm258_vm0, %v2134_v59  ;;  %395 = vmatprep.mubr.f32.mxu0 %v1999_v0 }
  0x2d   : > { %556 = vmatprep.mubr.f32.mxu1 %v1999_v0 }
  0x2e   : > { %981 = vperm.xlu0 %1845, %v955_v6  }
  0x2f   : > { %1723 = vmatmul.mubr.msk.f32.gmra.mrb[8].mxu0 %vm258_vm0, %v2151_v62  ;;  %986 = vperm.xlu1 %1846, %v956_v7  }
  0x30   : > { %1739 = vmatmul.mubr.msk.f32.gmra.mrb[8].mxu1 %vm258_vm0, %v2151_v62  ;;  %401 = vmatprep.mubr.f32.mxu0 %v1999_v0 }
  0x31   : > { %562 = vmatprep.mubr.f32.mxu1 %v1999_v0 }
  0x32   : > { %991 = vperm.xlu0 %1845, %v957_v9  }
  0x33   : > { %1724 = vmatmul.mubr.msk.f32.gmra.mrb[10].mxu0 %vm258_vm0, %v2168_v2  ;;  %996 = vperm.xlu1 %1846, %v958_v10  }
  0x34   : > { %1740 = vmatmul.mubr.msk.f32.gmra.mrb[10].mxu1 %vm258_vm0, %v2168_v2  ;;  %407 = vmatprep.mubr.f32.mxu0 %v1999_v0 }
  0x35   : > { %568 = vmatprep.mubr.f32.mxu1 %v1999_v0 }
  0x37   : > { %1725 = vmatmul.mubr.msk.f32.gmra.mrb[12].mxu0 %vm258_vm0, %v2185_v5 }
  0x38   : > { %1741 = vmatmul.mubr.msk.f32.gmra.mrb[12].mxu1 %vm258_vm0, %v2185_v5  ;;  %413 = vmatprep.mubr.f32.mxu0 %v1999_v0 }
  0x39   : > { %574 = vmatprep.mubr.f32.mxu1 %v1999_v0 }
  0x3b   : > { %1726 = vmatmul.mubr.msk.f32.gmra.mrb[14].mxu0 %vm258_vm0, %v2202_v8 }
  0x3c   : > { %1742 = vmatmul.mubr.msk.f32.gmra.mrb[14].mxu1 %vm258_vm0, %v2202_v8  ;;  %419 = vmatprep.mubr.f32.mxu0 %v1999_v0 }
  0x3d   : > { %580 = vmatprep.mubr.f32.mxu1 %v1999_v0 }
  0x3f   : > { %1727 = vmatmul.mubr.msk.f32.gmra.mrb[16].mxu0 %vm258_vm0, %v2219_v11 }
  0x40   : > { %1743 = vmatmul.mubr.msk.f32.gmra.mrb[16].mxu1 %vm258_vm0, %v2219_v11  ;;  %425 = vmatprep.mubr.f32.mxu0 %v1999_v0 }
  0x41   : > { %586 = vmatprep.mubr.f32.mxu1 %v1999_v0 }
  0x43   : > { %1728 = vmatmul.mubr.msk.f32.gmra.mrb[18].mxu0 %vm258_vm0, %v2230_v12 }
  0x44   : > { %1744 = vmatmul.mubr.msk.f32.gmra.mrb[18].mxu1 %vm258_vm0, %v2230_v12  ;;  %431 = vmatprep.mubr.f32.mxu0 %v1999_v0 }
  0x45   : > { %592 = vmatprep.mubr.f32.mxu1 %v1999_v0 }
  0x47   : > { %1729 = vmatmul.mubr.msk.f32.gmra.mrb[20].mxu0 %vm258_vm0, %v2241_v13 }
  0x48   : > { %1745 = vmatmul.mubr.msk.f32.gmra.mrb[20].mxu1 %vm258_vm0, %v2241_v13  ;;  %437 = vmatprep.mubr.f32.mxu0 %v1999_v0 }
  0x49   : > { %598 = vmatprep.mubr.f32.mxu1 %v1999_v0 }
  0x4b   : > { %1730 = vmatmul.mubr.msk.f32.gmra.mrb[22].mxu0 %vm258_vm0, %v2252_v14 }
  0x4c   : > { %1746 = vmatmul.mubr.msk.f32.gmra.mrb[22].mxu1 %vm258_vm0, %v2252_v14  ;;  %443 = vmatprep.mubr.f32.mxu0 %v1999_v0 }
  0x4d   : > { %604 = vmatprep.mubr.f32.mxu1 %v1999_v0 }
  0x4f   : > { %1731 = vmatmul.mubr.msk.f32.gmra.mrb[24].mxu0 %vm258_vm0, %v2263_v15 }
  0x50   : > { %1747 = vmatmul.mubr.msk.f32.gmra.mrb[24].mxu1 %vm258_vm0, %v2263_v15  ;;  %449 = vmatprep.mubr.f32.mxu0 %v1999_v0 }
  0x51   : > { %610 = vmatprep.mubr.f32.mxu1 %v1999_v0 }
  0x53   : > { %1732 = vmatmul.mubr.msk.f32.gmra.mrb[26].mxu0 %vm258_vm0, %v2274_v16 }
  0x54   : > { %1748 = vmatmul.mubr.msk.f32.gmra.mrb[26].mxu1 %vm258_vm0, %v2274_v16  ;;  %455 = vmatprep.mubr.f32.mxu0 %v1999_v0 }
  0x55   : > { %616 = vmatprep.mubr.f32.mxu1 %v1999_v0 }
  0x57   : > { %1733 = vmatmul.mubr.msk.f32.gmra.mrb[28].mxu0 %vm258_vm0, %v2285_v17 }
  0x58   : > { %1749 = vmatmul.mubr.msk.f32.gmra.mrb[28].mxu1 %vm258_vm0, %v2285_v17  ;;  %461 = vmatprep.mubr.f32.mxu0 %v1999_v0 }
  0x59   : > { %622 = vmatprep.mubr.f32.mxu1 %v1999_v0 }
  0x5b   : > { %1734 = vmatmul.mubr.msk.f32.gmra.mrb[30].mxu0 %vm258_vm0, %v2296_v18 }
  0x5c   : > { %1750 = vmatmul.mubr.msk.f32.gmra.mrb[30].mxu1 %vm258_vm0, %v2296_v18  ;;  %693 = vmatprep.mubr.f32.mxu0 %v1999_v0 }
  0x5d   : > { %854 = vmatprep.mubr.f32.mxu1 %v1999_v0 }
  0x5f   : > { %1751 = vmatmul.mubr.msk.f32.vlgmr.msra.gmra.mrb[32].mxu0 %vm258_vm0, %v2076_v30 }
  0x60   : > { %1767 = vmatmul.mubr.msk.f32.vlgmr.msra.gmra.mrb[32].mxu1 %vm258_vm0, %v2076_v30  ;;  %699 = vmatprep.mubr.f32.mxu0 %v1999_v0 }
  0x61   : > { %860 = vmatprep.mubr.f32.mxu1 %v1999_v0 }
  0x63   : > { %1752 = vmatmul.mubr.msk.f32.gmra.mrb[34].mxu0 %vm258_vm0, %v2102_v52 }
  0x64   : > { %1768 = vmatmul.mubr.msk.f32.gmra.mrb[34].mxu1 %vm258_vm0, %v2102_v52  ;;  %705 = vmatprep.mubr.f32.mxu0 %v1999_v0 }
  0x65   : > { %866 = vmatprep.mubr.f32.mxu1 %v1999_v0 }
  0x67   : > { %1753 = vmatmul.mubr.msk.f32.gmra.mrb[36].mxu0 %vm258_vm0, %v2117_v56 }
  0x68   : > { %1769 = vmatmul.mubr.msk.f32.gmra.mrb[36].mxu1 %vm258_vm0, %v2117_v56  ;;  %711 = vmatprep.mubr.f32.mxu0 %v1999_v0 }
  0x69   : > { %872 = vmatprep.mubr.f32.mxu1 %v1999_v0 }
  0x6b   : > { %1754 = vmatmul.mubr.msk.f32.gmra.mrb[38].mxu0 %vm258_vm0, %v2134_v59 }
  0x6c   : > { %1770 = vmatmul.mubr.msk.f32.gmra.mrb[38].mxu1 %vm258_vm0, %v2134_v59  ;;  %717 = vmatprep.mubr.f32.mxu0 %v1999_v0 }
  0x6d   : > { %878 = vmatprep.mubr.f32.mxu1 %v1999_v0 }
  0x6f   : > { %1755 = vmatmul.mubr.msk.f32.gmra.mrb[40].mxu0 %vm258_vm0, %v2151_v62 }
  0x70   : > { %1771 = vmatmul.mubr.msk.f32.gmra.mrb[40].mxu1 %vm258_vm0, %v2151_v62  ;;  %723 = vmatprep.mubr.f32.mxu0 %v1999_v0 }
  0x71   : > { %884 = vmatprep.mubr.f32.mxu1 %v1999_v0 }
  0x73   : > { %1756 = vmatmul.mubr.msk.f32.gmra.mrb[42].mxu0 %vm258_vm0, %v2168_v2 }
  0x74   : > { %1772 = vmatmul.mubr.msk.f32.gmra.mrb[42].mxu1 %vm258_vm0, %v2168_v2  ;;  %729 = vmatprep.mubr.f32.mxu0 %v1999_v0 }
  0x75   : > { %890 = vmatprep.mubr.f32.mxu1 %v1999_v0 }
  0x77   : > { %1757 = vmatmul.mubr.msk.f32.gmra.mrb[44].mxu0 %vm258_vm0, %v2185_v5 }
  0x78   : > { %1773 = vmatmul.mubr.msk.f32.gmra.mrb[44].mxu1 %vm258_vm0, %v2185_v5  ;;  %735 = vmatprep.mubr.f32.mxu0 %v1999_v0 }
  0x79   : > { %896 = vmatprep.mubr.f32.mxu1 %v1999_v0 }
  0x7b   : > { %1758 = vmatmul.mubr.msk.f32.gmra.mrb[46].mxu0 %vm258_vm0, %v2202_v8 }
  0x7c   : > { %1774 = vmatmul.mubr.msk.f32.gmra.mrb[46].mxu1 %vm258_vm0, %v2202_v8  ;;  %741 = vmatprep.mubr.f32.mxu0 %v1999_v0 }
  0x7d   : > { %902 = vmatprep.mubr.f32.mxu1 %v1999_v0 }
  0x7f   : > { %1759 = vmatmul.mubr.msk.f32.gmra.mrb[48].mxu0 %vm258_vm0, %v2219_v11 }
  0x80   : > { %1775 = vmatmul.mubr.msk.f32.gmra.mrb[48].mxu1 %vm258_vm0, %v2219_v11  ;;  %747 = vmatprep.mubr.f32.mxu0 %v1999_v0 }
  0x81   : > { %908 = vmatprep.mubr.f32.mxu1 %v1999_v0 }
  0x83   : > { %1760 = vmatmul.mubr.msk.f32.gmra.mrb[50].mxu0 %vm258_vm0, %v2230_v12 }
  0x84   : > { %1776 = vmatmul.mubr.msk.f32.gmra.mrb[50].mxu1 %vm258_vm0, %v2230_v12  ;;  %753 = vmatprep.mubr.f32.mxu0 %v1999_v0 }
  0x85   : > { %914 = vmatprep.mubr.f32.mxu1 %v1999_v0 }
  0x87   : > { %1761 = vmatmul.mubr.msk.f32.gmra.mrb[52].mxu0 %vm258_vm0, %v2241_v13 }
  0x88   : > { %1777 = vmatmul.mubr.msk.f32.gmra.mrb[52].mxu1 %vm258_vm0, %v2241_v13  ;;  %759 = vmatprep.mubr.f32.mxu0 %v1999_v0 }
  0x89   : > { %920 = vmatprep.mubr.f32.mxu1 %v1999_v0 }
  0x8b   : > { %1762 = vmatmul.mubr.msk.f32.gmra.mrb[54].mxu0 %vm258_vm0, %v2252_v14 }
  0x8c   : > { %1778 = vmatmul.mubr.msk.f32.gmra.mrb[54].mxu1 %vm258_vm0, %v2252_v14  ;;  %765 = vmatprep.mubr.f32.mxu0 %v1999_v0 }
  0x8d   : > { %926 = vmatprep.mubr.f32.mxu1 %v1999_v0 }
  0x8f   : > { %1763 = vmatmul.mubr.msk.f32.gmra.mrb[56].mxu0 %vm258_vm0, %v2263_v15 }
  0x90   : > { %1779 = vmatmul.mubr.msk.f32.gmra.mrb[56].mxu1 %vm258_vm0, %v2263_v15  ;;  %771 = vmatprep.mubr.f32.mxu0 %v1999_v0  ;;  %v2399_v26 = vpop.permute.xlu0 %1073  ;;  %v2401_v28 = vpop.permute.xlu1 %1083 }
  0x91   : > { %932 = vmatprep.mubr.f32.mxu1 %v1999_v0  ;;  %3203 = vst [vmem:[#allocation2_spill] sm:$0xff] %v2399_v26  ;;  %3204 = vst [vmem:[#allocation3_spill] sm:$0xff] %v2401_v28 }
  0x93   : > { %1764 = vmatmul.mubr.msk.f32.gmra.mrb[58].mxu0 %vm258_vm0, %v2274_v16 }
  0x94   : > { %1780 = vmatmul.mubr.msk.f32.gmra.mrb[58].mxu1 %vm258_vm0, %v2274_v16  ;;  %777 = vmatprep.mubr.f32.mxu0 %v1999_v0  ;;  %v2405_v32 = vpop.permute.xlu0 %1078  ;;  %v2411_v36 = vpop.permute.xlu1 %1088 }
  0x95   : > { %938 = vmatprep.mubr.f32.mxu1 %v1999_v0  ;;  %3205 = vst [vmem:[#allocation4_spill] sm:$0xff] %v2405_v32  ;;  %3206 = vst [vmem:[#allocation5_spill] sm:$0xff] %v2411_v36 }
  0x97   : > { %1765 = vmatmul.mubr.msk.f32.gmra.mrb[60].mxu0 %vm258_vm0, %v2285_v17 }
  0x98   : > { %1781 = vmatmul.mubr.msk.f32.gmra.mrb[60].mxu1 %vm258_vm0, %v2285_v17  ;;  %783 = vmatprep.mubr.f32.mxu0 %v1999_v0 }
  0x99   : > { %944 = vmatprep.mubr.f32.mxu1 %v1999_v0  ;;  %v2421_v41 = vpop.permute.xlu0 %1093 }
  0x9a   : > { %v2425_v43 = vpop.permute.xlu1 %1098 }
  0x9b   : > { %1766 = vmatmul.mubr.msk.f32.gmra.mrb[62].mxu0 %vm258_vm0, %v2296_v18 }
  0x9c   : > { %1782 = vmatmul.mubr.msk.f32.gmra.mrb[62].mxu1 %vm258_vm0, %v2296_v18 }
  0x9d   : > { %v2435_v48 = vpop.permute.xlu0 %1103 }
  0x9e   : > { %v2443_v52 = vpop.permute.xlu1 %1108 }
  0xa5   : > { %v2453_v57 = vpop.permute.xlu0 %961 }
  0xa6   : > { %3215 = vst [vmem:[#allocation14_spill] sm:$0xff] %v2453_v57  ;;  %v2457_v59 = vpop.permute.xlu1 %966 }
  0xa7   : > { %3217 = vst [vmem:[#allocation16_spill] sm:$0xff] %v2457_v59 }
  0xa9   : > { %v2469_v4 = vpop.permute.xlu0 %971 }
  0xaa   : > { %3218 = vst [vmem:[#allocation17_spill] sm:$0xff] %v2469_v4  ;;  %v2486_v14 = vpop.permute.xlu1 %976 }
  0xf2   : > { %v373_v19 = vpop.f32.mrb[0].mxu0 }
  0xf3   : > { %v534_v20 = vpop.f32.mrb[0].mxu1  ;;  %v375_v21 = vpop.f32.mrb[1].mxu0  ;;  %v2463_v62 = vadd.f32 %v2453_v57, %v373_v19 }
  0xf4   : > { %v536_v22 = vpop.f32.mrb[1].mxu1  ;;  %v2460_v61 = vadd.f32 %v2453_v57, %v375_v21  ;;  %v2472_v5 = vadd.f32 %v2453_v57, %v534_v20 }
  0xf5   : > { %v2467_v3 = vadd.f32 %v2453_v57, %v536_v22 }
  0xf6   : > { %v379_v23 = vpop.f32.mrb[2].mxu0 }
  0xf7   : > { %v540_v24 = vpop.f32.mrb[2].mxu1  ;;  %v381_v25 = vpop.f32.mrb[3].mxu0  ;;  %v2481_v12 = vadd.f32 %v2457_v59, %v379_v23 }
  0xf8   : > { %v542_v27 = vpop.f32.mrb[3].mxu1  ;;  %v2477_v9 = vadd.f32 %v2457_v59, %v381_v25  ;;  %v2489_v17 = vadd.f32 %v2457_v59, %v540_v24 }
  0xf9   : > { %v2484_v13 = vadd.f32 %v2457_v59, %v542_v27 }
  0xfa   : > { %v385_v29 = vpop.f32.mrb[4].mxu0 }
  0xfb   : > { %v2403_v0 = vpop.f32.mrb[4].mxu1  ;;  %v387_v30 = vpop.f32.mrb[5].mxu0  ;;  %v2495_v22 = vadd.f32 %v2469_v4, %v385_v29 }
  0xfc   : > { %v548_v31 = vpop.f32.mrb[5].mxu1  ;;  %v2492_v18 = vadd.f32 %v2469_v4, %v387_v30  ;;  %v2501_v24 = vadd.f32 %v2469_v4, %v2403_v0 }
  0xfd   : > { %v2504_v30 = vadd.f32 %v2469_v4, %v548_v31 }
  0xfe   : > { %v2407_v33 = vpop.f32.mrb[6].mxu0 }
  0xff   : > { %v2409_v34 = vpop.f32.mrb[6].mxu1  ;;  %v393_v35 = vpop.f32.mrb[7].mxu0 }
 0x100   : > { %v2413_v37 = vpop.f32.mrb[7].mxu1  ;;  %v2517_v31 = vadd.f32 %v2486_v14, %v2409_v34 }
 0x102   : > { %v2415_v38 = vpop.f32.mrb[8].mxu0 }
 0x103   : > { %v2417_v39 = vpop.f32.mrb[8].mxu1  ;;  %v2419_v40 = vpop.f32.mrb[9].mxu0 }
 0x104   : > { %v2423_v42 = vpop.f32.mrb[9].mxu1 }
 0x106   : > { %v2427_v44 = vpop.f32.mrb[10].mxu0 }
 0x107   : > { %v2429_v45 = vpop.f32.mrb[10].mxu1  ;;  %v2431_v46 = vpop.f32.mrb[11].mxu0 }
 0x108   : > { %v2433_v47 = vpop.f32.mrb[11].mxu1 }
 0x109   : > { %3207 = vst [vmem:[#allocation6_spill] sm:$0xff] %v2433_v47 }
 0x10a   : > { %v2437_v49 = vpop.f32.mrb[12].mxu0 }
 0x10b   : > { %3208 = vst [vmem:[#allocation7_spill] sm:$0xff] %v2437_v49  ;;  %v2439_v50 = vpop.f32.mrb[12].mxu1  ;;  %v2441_v51 = vpop.f32.mrb[13].mxu0 }
 0x10c   : > { %3209 = vst [vmem:[#allocation8_spill] sm:$0xff] %v2439_v50  ;;  %3210 = vst [vmem:[#allocation9_spill] sm:$0xff] %v2441_v51  ;;  %v2445_v53 = vpop.f32.mrb[13].mxu1 }
 0x10d   : > { %3211 = vst [vmem:[#allocation10_spill] sm:$0xff] %v2445_v53 }
 0x10e   : > { %v2447_v54 = vpop.f32.mrb[14].mxu0 }
 0x10f   : > { %3212 = vst [vmem:[#allocation11_spill] sm:$0xff] %v2447_v54  ;;  %v2449_v55 = vpop.f32.mrb[14].mxu1  ;;  %v2451_v56 = vpop.f32.mrb[15].mxu0 }
 0x110   : > { %3213 = vst [vmem:[#allocation12_spill] sm:$0xff] %v2449_v55  ;;  %3214 = vst [vmem:[#allocation13_spill] sm:$0xff] %v2451_v56  ;;  %v2455_v58 = vpop.f32.mrb[15].mxu1 }
 0x111   : > { %3216 = vst [vmem:[#allocation15_spill] sm:$0xff] %v2455_v58 }
 0x112   : > { %v421_v60 = vpop.f32.mrb[16].mxu0 }
 0x113   : > { %v1111_v63 = vadd.f32 %v2399_v26, %v421_v60  ;;  %v582_v1 = vpop.f32.mrb[16].mxu1  ;;  %v423_v2 = vpop.f32.mrb[17].mxu0 }
 0x114   : > { %v1113_v6 = vadd.f32 %v2399_v26, %v582_v1  ;;  %v1112_v7 = vadd.f32 %v2399_v26, %v423_v2  ;;  %v584_v8 = vpop.f32.mrb[17].mxu1  ;;  %v2509_v2 = vadd.f32 %v2486_v14, %v393_v35 }
 0x115   : > { %v1239_v10 = vmul.f32 0.70710677, %v1111_v63  ;;  %v1114_v11 = vadd.f32 %v2399_v26, %v584_v8  ;;  %v1175_v0 = vmul.f32 0.5, %v1111_v63 }
 0x116   : > { %v1241_v15 = vmul.f32 0.70710677, %v1113_v6  ;;  %v1240_v16 = vmul.f32 0.70710677, %v1112_v7  ;;  %v427_v20 = vpop.f32.mrb[18].mxu0 }
 0x117   : > { %1847 = verf.f32 %v1239_v10  ;;  %v1242_v19 = vmul.f32 0.70710677, %v1114_v11  ;;  %v588_v21 = vpop.f32.mrb[18].mxu1  ;;  %v1119_v23 = vadd.f32 %v2405_v32, %v427_v20  ;;  %v429_v27 = vpop.f32.mrb[19].mxu0  ;;  %v1178_v4 = vmul.f32 0.5, %v1114_v11 }
 0x118   : > { %1849 = verf.f32 %v1241_v15  ;;  %v1121_v25 = vadd.f32 %v2405_v32, %v588_v21  ;;  %v590_v60 = vpop.f32.mrb[19].mxu1  ;;  %v1120_v1 = vadd.f32 %v2405_v32, %v429_v27  ;;  %v2513_v15 = vadd.f32 %v2486_v14, %v2407_v33 }
 0x119   : > { %1851 = verf.f32 %v1240_v16  ;;  %v1122_v29 = vadd.f32 %v2405_v32, %v590_v60  ;;  %v1247_v8 = vmul.f32 0.70710677, %v1119_v23  ;;  %v1177_v16 = vmul.f32 0.5, %v1113_v6 }
 0x11a   : > { %1853 = verf.f32 %v1242_v19  ;;  %v433_v10 = vpop.f32.mrb[20].mxu0  ;;  %v1249_v20 = vmul.f32 0.70710677, %v1121_v25  ;;  %v1248_v21 = vmul.f32 0.70710677, %v1120_v1  ;;  %v1176_v32 = vmul.f32 0.5, %v1112_v7 }
 0x11b   : > { %1855 = verf.f32 %v1247_v8  ;;  %v1250_v27 = vmul.f32 0.70710677, %v1122_v29  ;;  %v1127_v35 = vadd.f32 %v2401_v28, %v433_v10  ;;  %v594_v60 = vpop.f32.mrb[20].mxu1  ;;  %v435_v19 = vpop.f32.mrb[21].mxu0  ;;  %v2523_v6 = vmul.f32 0.5, %v1119_v23 }
 0x11c   : > { %1857 = verf.f32 %v1249_v20  ;;  %v1129_v26 = vadd.f32 %v2401_v28, %v594_v60  ;;  %v1128_v33 = vadd.f32 %v2401_v28, %v435_v19  ;;  %v596_v63 = vpop.f32.mrb[21].mxu1  ;;  %v2525_v8 = vmul.f32 0.5, %v1121_v25 }
 0x11d   : > { %1859 = verf.f32 %v1248_v21  ;;  %v1255_v59 = vmul.f32 0.70710677, %v1127_v35  ;;  %v1130_v34 = vadd.f32 %v2401_v28, %v596_v63  ;;  %v2527_v58 = vmul.f32 0.5, %v1120_v1 }
 0x11e   : > { %v439_v57 = vpop.f32.mrb[22].mxu0  ;;  %1861 = verf.f32 %v1250_v27  ;;  %v1257_v10 = vmul.f32 0.70710677, %v1129_v26  ;;  %v1256_v60 = vmul.f32 0.70710677, %v1128_v33  ;;  %v2529_v56 = vmul.f32 0.5, %v1122_v29 }
 0x11f   : > { %v600_v7 = vpop.f32.mrb[22].mxu1  ;;  %v441_v20 = vpop.f32.mrb[23].mxu0  ;;  %1863 = verf.f32 %v1255_v59  ;;  %v1258_v19 = vmul.f32 0.70710677, %v1130_v34  ;;  %v1135_v23 = vadd.f32 %v2411_v36, %v439_v57  ;;  %v2536_v28 = vmul.f32 0.5, %v1127_v35 }
 0x120   : > { %v602_v11 = vpop.f32.mrb[23].mxu1  ;;  %1865 = verf.f32 %v1257_v10  ;;  %v2533_v25 = vadd.f32 %v2411_v36, %v600_v7  ;;  %v2539_v59 = vadd.f32 %v2411_v36, %v441_v20  ;;  %v2541_v29 = vmul.f32 0.5, %v1129_v26 }
 0x121   : > { %v1848_v21 = vpop.eup %1847  ;;  %1867 = verf.f32 %v1256_v60  ;;  %v1263_v10 = vmul.f32 0.70710677, %v1135_v23  ;;  %v2547_v60 = vadd.f32 %v2411_v36, %v602_v11 }
 0x122   : > { %v1850_v63 = vpop.eup %1849  ;;  %v1367_v27 = vadd.f32 1.0, %v1848_v21  ;;  %v445_v1 = vpop.f32.mrb[24].mxu0  ;;  %1869 = verf.f32 %v1258_v19  ;;  %v1265_v35 = vmul.f32 0.70710677, %v2533_v25  ;;  %v2556_v21 = vmul.f32 0.5, %v1128_v33 }
 0x123   : > { %v1852_v55 = vpop.eup %1851  ;;  %v1369_v54 = vadd.f32 1.0, %v1850_v63  ;;  %v606_v57 = vpop.f32.mrb[24].mxu1  ;;  %1871 = verf.f32 %v1263_v10  ;;  %v1264_v11 = vmul.f32 0.70710677, %v2539_v59 }
 0x124   : > { %v2543_v53 = vpop.f32.mrb[25].mxu0  ;;  %v1854_v7 = vpop.eup %1853  ;;  %v1431_v50 = vmul.f32 %v1367_v27, %v1175_v0  ;;  %v1368_v51 = vadd.f32 1.0, %v1852_v55  ;;  %1873 = verf.f32 %v1265_v35 }
 0x125   : > { %v2549_v20 = vpop.f32.mrb[25].mxu1  ;;  %v1433_v26 = vmul.f32 %v1369_v54, %v1177_v16  ;;  %v1370_v19 = vadd.f32 1.0, %v1854_v7  ;;  %v1856_v0 = vpop.eup %1855  ;;  %v1194_v16 = vmul.f32 0.5, %v1130_v34  ;;  %1875 = verf.f32 %v1264_v11 }
 0x126   : > { %v1495_v55 = vmul.f32 %v1431_v50, %v2463_v62  ;;  %v1432_v63 = vmul.f32 %v1368_v51, %v1176_v32  ;;  %v2560_v27 = vpop.f32.mrb[26].mxu0  ;;  %v1858_v36 = vpop.eup %1857  ;;  %v1375_v54 = vadd.f32 1.0, %v1856_v0  ;;  %v1266_v51 = vmul.f32 0.70710677, %v2547_v60 }
 0x127   : > { %v1497_v49 = vmul.f32 %v1433_v26, %v2472_v5  ;;  %v1434_v47 = vmul.f32 %v1370_v19, %v1178_v4  ;;  %v2563_v33 = vpop.f32.mrb[26].mxu1  ;;  %v2565_v10 = vpop.f32.mrb[27].mxu0  ;;  %v1377_v50 = vadd.f32 1.0, %v1858_v36  ;;  %v2576_v26 = vadd.f32 %v2421_v41, %v445_v1 }
 0x128   : > { %v1860_v7 = vpop.eup %1859  ;;  %1559 = vst [vmem:[%s2554_s17] sm:$0xff] %v1495_v55  ;;  %v1496_v32 = vmul.f32 %v1432_v63, %v2460_v61  ;;  %v2570_v62 = vpop.f32.mrb[27].mxu1  ;;  %v1439_v34 = vmul.f32 %v1375_v54, %v2523_v6  ;;  %v1199_v0 = vmul.f32 0.5, %v1135_v23  ;;  %1877 = verf.f32 %v1266_v51 }
 0x129   : > { %v1862_v5 = vpop.eup %1861  ;;  %1561 = vst [vmem:[%s2554_s17 + $0x10] sm:$0xff] %v1497_v49  ;;  %v1498_v4 = vmul.f32 %v1434_v47, %v2467_v3  ;;  %v1376_v35 = vadd.f32 1.0, %v1860_v7  ;;  %v1441_v36 = vmul.f32 %v1377_v50, %v2525_v8  ;;  %v2586_v6 = vadd.f32 %v2421_v41, %v606_v57 }
 0x12a   : > { %v1864_v19 = vpop.eup %1863  ;;  %1560 = vst [vmem:[%s2554_s17 + $0x8] sm:$0xff] %v1496_v32  ;;  %v1378_v61 = vadd.f32 1.0, %v1862_v5  ;;  %v2580_v55 = vpop.f32.mrb[28].mxu0  ;;  %v1503_v47 = vmul.f32 %v1439_v34, %v2481_v12  ;;  %v1271_v12 = vmul.f32 0.70710677, %v2576_v26  ;;  %v1201_v5 = vmul.f32 0.5, %v2533_v25 }
 0x12b   : > { %v1866_v63 = vpop.eup %1865  ;;  %1562 = vst [vmem:[%s2554_s17 + $0x18] sm:$0xff] %v1498_v4  ;;  %v1440_v49 = vmul.f32 %v1376_v35, %v2527_v58  ;;  %v1383_v3 = vadd.f32 1.0, %v1864_v19  ;;  %v2588_v1 = vpop.f32.mrb[28].mxu1  ;;  %v1505_v11 = vmul.f32 %v1441_v36, %v2489_v17  ;;  %v1273_v19 = vmul.f32 0.70710677, %v2586_v6 }
 0x12c   : > { %v2590_v8 = vpop.f32.mrb[29].mxu0  ;;  %v1868_v23 = vpop.eup %1867  ;;  %v1442_v54 = vmul.f32 %v1378_v61, %v2529_v56  ;;  %v1385_v7 = vadd.f32 1.0, %v1866_v63  ;;  %1567 = vst [vmem:[%s2554_s17 + $0x40] sm:$0xff] %v1503_v47  ;;  %1879 = verf.f32 %v1271_v12  ;;  %v2612_v25 = vadd.f32 %v2421_v41, %v2543_v53 }
 0x12d   : > { %v2595_v32 = vpop.f32.mrb[29].mxu1  ;;  %v1870_v58 = vpop.eup %1869  ;;  %v1504_v57 = vmul.f32 %v1440_v49, %v2477_v9  ;;  %v1447_v50 = vmul.f32 %v1383_v3, %v2536_v28  ;;  %v1384_v51 = vadd.f32 1.0, %v1868_v23  ;;  %1569 = vst [vmem:[%s2554_s17 + $0x50] sm:$0xff] %v1505_v11  ;;  %v1200_v3 = vmul.f32 0.5, %v2539_v59 }
 0x12e   : > { %v1506_v17 = vmul.f32 %v1442_v54, %v2484_v13  ;;  %v1449_v56 = vmul.f32 %v1385_v7, %v2541_v29  ;;  %v1386_v4 = vadd.f32 1.0, %v1870_v58  ;;  %v2604_v34 = vpop.f32.mrb[30].mxu0  ;;  %v1872_v35 = vpop.eup %1871  ;;  %1881 = verf.f32 %v1273_v19 }
 0x12f   : > { %1568 = vst [vmem:[%s2554_s17 + $0x48] sm:$0xff] %v1504_v57  ;;  %v1511_v9 = vmul.f32 %v1447_v50, %v2495_v22  ;;  %v1448_v28 = vmul.f32 %v1384_v51, %v2556_v21  ;;  %v2614_v13 = vpop.f32.mrb[30].mxu1  ;;  %v2616_v29 = vpop.f32.mrb[31].mxu0  ;;  %v1391_v47 = vadd.f32 1.0, %v1872_v35  ;;  %v2622_v22 = vadd.f32 %v2421_v41, %v2549_v20 }
 0x130   : > { %v1874_v36 = vpop.eup %1873  ;;  %1570 = vst [vmem:[%s2554_s17 + $0x58] sm:$0xff] %v1506_v17  ;;  %v1513_v61 = vmul.f32 %v1449_v56, %v2501_v24  ;;  %v1450_v63 = vmul.f32 %v1386_v4, %v1194_v16  ;;  %v2624_v21 = vpop.f32.mrb[31].mxu1  ;;  %v1202_v20 = vmul.f32 0.5, %v2547_v60  ;;  %v1272_v54 = vmul.f32 0.70710677, %v2612_v25 }
 0x131   : > { %1575 = vst [vmem:[%s2554_s17 + $0x80] sm:$0xff] %v1511_v9  ;;  %v1512_v53 = vmul.f32 %v1448_v28, %v2492_v18  ;;  %v1393_v49 = vadd.f32 1.0, %v1874_v36  ;;  %v1876_v23 = vpop.eup %1875  ;;  %v2629_v11 = vpop.permute.xlu0 %981  ;;  %v1455_v16 = vmul.f32 %v1391_v47, %v1199_v0  ;;  %v1274_v59 = vmul.f32 0.70710677, %v2622_v22 }
 0x132   : > { %1577 = vst [vmem:[%s2554_s17 + $0x90] sm:$0xff] %v1513_v61  ;;  %v1514_v24 = vmul.f32 %v1450_v63, %v2504_v30  ;;  %v2635_v7 = vpop.f32.mrb[32].mxu0  ;;  %v1392_v12 = vadd.f32 1.0, %v1876_v23  ;;  %v2641_v58 = vadd.f32 %v2425_v43, %v2560_v27  ;;  %v1878_v0 = vpop.eup %1877  ;;  %1883 = verf.f32 %v1272_v54 }
 0x133   : > { %1576 = vst [vmem:[%s2554_s17 + $0x88] sm:$0xff] %v1512_v53  ;;  %v1457_v18 = vmul.f32 %v1393_v49, %v1201_v5  ;;  %v2643_v57 = vpop.f32.mrb[32].mxu1  ;;  %v2645_v30 = vpop.f32.mrb[33].mxu0  ;;  %v1519_v60 = vmul.f32 %v1455_v16, %v2513_v15  ;;  %v2651_v50 = vadd.f32 %v2425_v43, %v2563_v33  ;;  %v2655_v51 = vadd.f32 %v2425_v43, %v2565_v10 }
 0x134   : > { %1578 = vst [vmem:[%s2554_s17 + $0x98] sm:$0xff] %v1514_v24  ;;  %v2657_v27 = vpop.f32.mrb[33].mxu1  ;;  %v1456_v17 = vmul.f32 %v1392_v12, %v1200_v3  ;;  %v1394_v56 = vadd.f32 1.0, %v1878_v0  ;;  %1885 = verf.f32 %v1274_v59  ;;  %v1026_v4 = vadd.f32 %v2486_v14, %v2413_v37 }
 0x135   : > { %v1521_v5 = vmul.f32 %v1457_v18, %v2517_v31  ;;  %1583 = vst [vmem:[%s2554_s17 + $0xc0] sm:$0xff] %v1519_v60  ;;  %v1031_v15 = vadd.f32 %v2629_v11, %v2415_v38  ;;  %v1279_v33 = vmul.f32 0.70710677, %v2641_v58  ;;  %v1281_v10 = vmul.f32 0.70710677, %v2651_v50 }
 0x136   : > { %v1520_v35 = vmul.f32 %v1456_v17, %v2509_v2  ;;  %v1458_v9 = vmul.f32 %v1394_v56, %v1202_v20  ;;  %v1207_v31 = vmul.f32 0.5, %v2576_v26  ;;  %v1280_v28 = vmul.f32 0.70710677, %v2655_v51  ;;  %v2671_v19 = vpop.f32.mrb[34].mxu0  ;;  %v1880_v36 = vpop.eup %1879 }
 0x137   : > { %1585 = vst [vmem:[%s2554_s17 + $0xd0] sm:$0xff] %v1521_v5  ;;  %v2673_v37 = vpop.f32.mrb[34].mxu1  ;;  %1887 = verf.f32 %v1279_v33  ;;  %v2677_v38 = vadd.f32 %v2425_v43, %v2570_v62  ;;  %v2681_v61 = vadd.f32 %v2435_v48, %v2580_v55  ;;  %v2685_v2 = vadd.f32 %v2435_v48, %v2588_v1  ;;  %v2687_v26 = vpop.f32.mrb[35].mxu0 }
 0x138   : > { %v2689_v63 = vpop.f32.mrb[35].mxu1  ;;  %1584 = vst [vmem:[%s2554_s17 + $0xc8] sm:$0xff] %v1520_v35  ;;  %v1522_v47 = vmul.f32 %v1458_v9, %v1026_v4  ;;  %v1399_v53 = vadd.f32 1.0, %v1880_v36  ;;  %1889 = verf.f32 %v1281_v10  ;;  %v2694_v62 = vadd.f32 %v2435_v48, %v2590_v8  ;;  %v1882_v23 = vpop.eup %1881 }
 0x139   : > { %v1032_v55 = vadd.f32 %v2629_v11, %v2419_v40  ;;  %v1033_v49 = vadd.f32 %v2629_v11, %v2417_v39  ;;  %1891 = verf.f32 %v1280_v28  ;;  %v1282_v1 = vmul.f32 0.70710677, %v2677_v38  ;;  %v2724_v5 = vpop.permute.xlu1 %986 }
 0x13a   : > { %v2701_v3 = vpop.f32.mrb[36].mxu0  ;;  %v1034_v24 = vadd.f32 %v2629_v11, %v2423_v42  ;;  %1586 = vst [vmem:[%s2554_s17 + $0xd8] sm:$0xff] %v1522_v47  ;;  %v1463_v16 = vmul.f32 %v1399_v53, %v1207_v31  ;;  %v1287_v8 = vmul.f32 0.70710677, %v2681_v61  ;;  %v1289_v20 = vmul.f32 0.70710677, %v2685_v2 }
 0x13b   : > { %v2708_v54 = vpop.f32.mrb[36].mxu1  ;;  %v1209_v40 = vmul.f32 0.5, %v2586_v6  ;;  %v1401_v39 = vadd.f32 1.0, %v1882_v23  ;;  %1893 = verf.f32 %v1282_v1  ;;  %v1288_v18 = vmul.f32 0.70710677, %v2694_v62  ;;  %v2712_v12 = vpop.f32.mrb[37].mxu0 }
 0x13c   : > { %v2714_v59 = vpop.f32.mrb[37].mxu1  ;;  %v1527_v42 = vmul.f32 %v1463_v16, %v1031_v15  ;;  %1895 = verf.f32 %v1287_v8  ;;  %v2718_v0 = vadd.f32 %v2435_v48, %v2595_v32  ;;  %v2722_v60 = vadd.f32 %v2443_v52, %v2604_v34  ;;  %v1884_v6 = vpop.eup %1883  ;;  %3219 = vst [vmem:[#allocation18_spill] sm:$0xff] %v2724_v5 }
 0x13d   : > { %v1465_v17 = vmul.f32 %v1401_v39, %v1209_v40  ;;  %1897 = verf.f32 %v1289_v20  ;;  %v2728_v56 = vadd.f32 %v2443_v52, %v2614_v13  ;;  %v2732_v4 = vadd.f32 %v2443_v52, %v2616_v29 }
 0x13e   : > { %v2734_v15 = vpop.f32.mrb[38].mxu0  ;;  %v1886_v32 = vpop.eup %1885  ;;  %1591 = vst [vmem:[%s2554_s17 + $0x100] sm:$0xff] %v1527_v42  ;;  %v1208_v34 = vmul.f32 0.5, %v2612_v25  ;;  %v1400_v33 = vadd.f32 1.0, %v1884_v6  ;;  %1899 = verf.f32 %v1288_v18  ;;  %v1290_v10 = vmul.f32 0.70710677, %v2718_v0 }
 0x13f   : > { %v2739_v35 = vpop.f32.mrb[38].mxu1  ;;  %v2741_v9 = vpop.f32.mrb[39].mxu0  ;;  %v1529_v13 = vmul.f32 %v1465_v17, %v1033_v49  ;;  %v1210_v31 = vmul.f32 0.5, %v2622_v22  ;;  %v1402_v29 = vadd.f32 1.0, %v1886_v32  ;;  %v1295_v28 = vmul.f32 0.70710677, %v2722_v60 }
 0x140   : > { %v2745_v36 = vpop.f32.mrb[39].mxu1  ;;  %v1464_v47 = vmul.f32 %v1400_v33, %v1208_v34  ;;  %v1039_v25 = vadd.f32 %v2724_v5, %v2427_v44  ;;  %1901 = verf.f32 %v1290_v10  ;;  %v1297_v53 = vmul.f32 0.70710677, %v2728_v56 }
 0x141   : > { %v1888_v1 = vpop.eup %1887  ;;  %1593 = vst [vmem:[%s2554_s17 + $0x110] sm:$0xff] %v1529_v13  ;;  %v1466_v23 = vmul.f32 %v1402_v29, %v1210_v31  ;;  %v1215_v16 = vmul.f32 0.5, %v2641_v58  ;;  %1903 = verf.f32 %v1295_v28  ;;  %v1296_v22 = vmul.f32 0.70710677, %v2732_v4  ;;  %v2771_v31 = vpop.permute.xlu0 %991 }
 0x142   : > { %v2753_v49 = vpop.f32.mrb[40].mxu0  ;;  %v1890_v8 = vpop.eup %1889  ;;  %v1528_v20 = vmul.f32 %v1464_v47, %v1032_v55  ;;  %v1407_v40 = vadd.f32 1.0, %v1888_v1  ;;  %1905 = verf.f32 %v1297_v53  ;;  %v2757_v44 = vadd.f32 %v2443_v52, %v2624_v21  ;;  %3220 = vst [vmem:[#allocation19_spill] sm:$0xff] %v2771_v31 }
 0x143   : > { %v2759_v39 = vpop.f32.mrb[40].mxu1  ;;  %v2761_v18 = vpop.f32.mrb[41].mxu0  ;;  %v1530_v42 = vmul.f32 %v1466_v23, %v1034_v24  ;;  %v1217_v6 = vmul.f32 0.5, %v2651_v50  ;;  %v1409_v17 = vadd.f32 1.0, %v1890_v8  ;;  %1907 = verf.f32 %v1296_v22  ;;  %v3224_v22 = vld [vmem:[#allocation6_spill] sm:$0xff] }
 0x144   : > { %v1892_v58 = vpop.eup %1891  ;;  %v2764_v32 = vpop.f32.mrb[41].mxu1  ;;  %1592 = vst [vmem:[%s2554_s17 + $0x108] sm:$0xff] %v1528_v20  ;;  %v1471_v55 = vmul.f32 %v1407_v40, %v1215_v16  ;;  %v1216_v34 = vmul.f32 0.5, %v2655_v51  ;;  %v1298_v21 = vmul.f32 0.70710677, %v2757_v44  ;;  %v1040_v13 = vadd.f32 %v2724_v5, %v2431_v46 }
 0x145   : > { %v1408_v33 = vadd.f32 1.0, %v1892_v58  ;;  %v1894_v10 = vpop.eup %1893  ;;  %1594 = vst [vmem:[%s2554_s17 + $0x118] sm:$0xff] %v1530_v42  ;;  %v1041_v50 = vadd.f32 %v2724_v5, %v2429_v45  ;;  %v1473_v24 = vmul.f32 %v1409_v17, %v1217_v6  ;;  %v1218_v29 = vmul.f32 0.5, %v2677_v38 }
 0x146   : > { %v2777_v28 = vpop.f32.mrb[42].mxu0  ;;  %v1896_v51 = vpop.eup %1895  ;;  %v1535_v47 = vmul.f32 %v1471_v55, %v1039_v25  ;;  %v1410_v1 = vadd.f32 1.0, %v1894_v10  ;;  %1909 = verf.f32 %v1298_v21  ;;  %v1042_v45 = vadd.f32 %v2724_v5, %v3224_v22  ;;  %v3226_v55 = vld [vmem:[#allocation7_spill] sm:$0xff] }
 0x147   : > { %3221 = vst [vmem:[#allocation20_spill] sm:$0xff] %v2777_v28  ;;  %v1472_v53 = vmul.f32 %v1408_v33, %v1216_v34  ;;  %v2779_v23 = vpop.f32.mrb[42].mxu1  ;;  %v2781_v46 = vpop.f32.mrb[43].mxu0  ;;  %v1537_v8 = vmul.f32 %v1473_v24, %v1041_v50  ;;  %v1223_v38 = vmul.f32 0.5, %v2681_v61  ;;  %v1415_v20 = vadd.f32 1.0, %v1896_v51  ;;  %v3228_v24 = vld [vmem:[#allocation9_spill] sm:$0xff] }
 0x148   : > { %3222 = vst [vmem:[#allocation21_spill] sm:$0xff] %v2779_v23  ;;  %3223 = vst [vmem:[#allocation22_spill] sm:$0xff] %v2781_v46  ;;  %v1898_v16 = vpop.eup %1897  ;;  %v2786_v40 = vpop.f32.mrb[43].mxu1  ;;  %v1474_v42 = vmul.f32 %v1410_v1, %v1218_v29  ;;  %v1225_v6 = vmul.f32 0.5, %v2685_v2  ;;  %v1047_v34 = vadd.f32 %v2771_v31, %v3226_v55  ;;  %v1224_v21 = vmul.f32 0.5, %v2694_v62  ;;  %v3229_v29 = vld [vmem:[#allocation8_spill] sm:$0xff] }
 0x149   : > { %3225 = vst [vmem:[#allocation6_spill] sm:$0xff] %v2786_v40  ;;  %v1900_v25 = vpop.eup %1899  ;;  %1599 = vst [vmem:[%s2554_s17 + $0x140] sm:$0xff] %v1535_v47  ;;  %v1536_v58 = vmul.f32 %v1472_v53, %v1040_v13  ;;  %v1417_v17 = vadd.f32 1.0, %v1898_v16  ;;  %v1479_v33 = vmul.f32 %v1415_v20, %v1223_v38  ;;  %v1048_v51 = vadd.f32 %v2771_v31, %v3228_v24  ;;  %v2805_v16 = vpop.permute.xlu1 %996 }
 0x14a   : > { %1601 = vst [vmem:[%s2554_s17 + $0x150] sm:$0xff] %v1537_v8  ;;  %v1416_v10 = vadd.f32 1.0, %v1900_v25  ;;  %v2794_v61 = vpop.f32.mrb[44].mxu0  ;;  %v1902_v50 = vpop.eup %1901  ;;  %v1538_v13 = vmul.f32 %v1474_v42, %v1042_v45  ;;  %v1049_v2 = vadd.f32 %v2771_v31, %v3229_v29  ;;  %3232 = vst [vmem:[#allocation23_spill] sm:$0xff] %v2805_v16  ;;  %v1226_v38 = vmul.f32 0.5, %v2718_v0 }
 0x14b   : > { %3227 = vst [vmem:[#allocation7_spill] sm:$0xff] %v2794_v61  ;;  %1600 = vst [vmem:[%s2554_s17 + $0x148] sm:$0xff] %v1536_v58  ;;  %v1481_v47 = vmul.f32 %v1417_v17, %v1225_v6  ;;  %v2801_v53 = vpop.f32.mrb[44].mxu1  ;;  %v2803_v1 = vpop.f32.mrb[45].mxu0  ;;  %v1543_v22 = vmul.f32 %v1479_v33, %v1047_v34  ;;  %v1418_v20 = vadd.f32 1.0, %v1902_v50  ;;  %v3234_v58 = vld [vmem:[#allocation10_spill] sm:$0xff] }
 0x14c   : > { %3230 = vst [vmem:[#allocation9_spill] sm:$0xff] %v2801_v53  ;;  %3231 = vst [vmem:[#allocation8_spill] sm:$0xff] %v2803_v1  ;;  %v1904_v62 = vpop.eup %1903  ;;  %v1480_v8 = vmul.f32 %v1416_v10, %v1224_v21  ;;  %v2808_v25 = vpop.f32.mrb[45].mxu1  ;;  %v1050_v42 = vadd.f32 %v2771_v31, %v3234_v58  ;;  %v1231_v17 = vmul.f32 0.5, %v2722_v60  ;;  %v1233_v0 = vmul.f32 0.5, %v2728_v56  ;;  %v3236_v50 = vld [vmem:[#allocation11_spill] sm:$0xff] }
 0x14d   : > { %3233 = vst [vmem:[#allocation24_spill] sm:$0xff] %v2808_v25  ;;  %v1906_v45 = vpop.eup %1905  ;;  %1602 = vst [vmem:[%s2554_s17 + $0x158] sm:$0xff] %v1538_v13  ;;  %v1545_v6 = vmul.f32 %v1481_v47, %v1049_v2  ;;  %v1423_v55 = vadd.f32 1.0, %v1904_v62  ;;  %v1482_v33 = vmul.f32 %v1418_v20, %v1226_v38  ;;  %v1055_v29 = vadd.f32 %v2805_v16, %v3236_v50  ;;  %v3239_v56 = vld [vmem:[#allocation12_spill] sm:$0xff] }
 0x14e   : > { %v1908_v24 = vpop.eup %1907  ;;  %1607 = vst [vmem:[%s2554_s17 + $0x180] sm:$0xff] %v1543_v22  ;;  %v1544_v34 = vmul.f32 %v1480_v8, %v1048_v51  ;;  %v1425_v21 = vadd.f32 1.0, %v1906_v45  ;;  %v2816_v10 = vpop.f32.mrb[46].mxu0  ;;  %v1232_v2 = vmul.f32 0.5, %v2732_v4  ;;  %v1057_v22 = vadd.f32 %v2805_v16, %v3239_v56  ;;  %v3241_v45 = vld [vmem:[#allocation13_spill] sm:$0xff] }
 0x14f   : > { %3235 = vst [vmem:[#allocation10_spill] sm:$0xff] %v2816_v10  ;;  %1609 = vst [vmem:[%s2554_s17 + $0x190] sm:$0xff] %v1545_v6  ;;  %v1487_v13 = vmul.f32 %v1423_v55, %v1231_v17  ;;  %v1424_v60 = vadd.f32 1.0, %v1908_v24  ;;  %v2822_v47 = vpop.f32.mrb[46].mxu1  ;;  %v2824_v62 = vpop.f32.mrb[47].mxu0  ;;  %v1546_v51 = vmul.f32 %v1482_v33, %v1050_v42  ;;  %v1056_v58 = vadd.f32 %v2805_v16, %v3241_v45  ;;  %v3242_v6 = vld [vmem:[#allocation15_spill] sm:$0xff] }
 0x150   : > { %3237 = vst [vmem:[#allocation11_spill] sm:$0xff] %v2822_v47  ;;  %3238 = vst [vmem:[#allocation25_spill] sm:$0xff] %v2824_v62  ;;  %v1489_v8 = vmul.f32 %v1425_v21, %v1233_v0  ;;  %v2829_v38 = vpop.f32.mrb[47].mxu1  ;;  %v1910_v20 = vpop.eup %1909  ;;  %v1058_v4 = vadd.f32 %v2805_v16, %v3242_v6  ;;  %v1234_v42 = vmul.f32 0.5, %v2757_v44  ;;  %v3243_v33 = vld [vmem:[#allocation14_spill] sm:$0xff] }
 0x151   : > { %1608 = vst [vmem:[%s2554_s17 + $0x188] sm:$0xff] %v1544_v34  ;;  %3240 = vst [vmem:[#allocation12_spill] sm:$0xff] %v2829_v38  ;;  %v1551_v17 = vmul.f32 %v1487_v13, %v1055_v29  ;;  %v1488_v55 = vmul.f32 %v1424_v60, %v1232_v2  ;;  %v1426_v34 = vadd.f32 1.0, %v1910_v20  ;;  %v2839_v0 = vadd.f32 %v3243_v33, %v2635_v7  ;;  %v3244_v60 = vld [vmem:[#allocation16_spill] sm:$0xff] }
 0x152   : > { %1610 = vst [vmem:[%s2554_s17 + $0x198] sm:$0xff] %v1546_v51  ;;  %v1553_v24 = vmul.f32 %v1489_v8, %v1057_v22  ;;  %v743_v21 = vpop.f32.mrb[48].mxu0  ;;  %v2844_v56 = vadd.f32 %v3243_v33, %v2643_v57  ;;  %v2848_v29 = vadd.f32 %v3243_v33, %v2645_v30  ;;  %v2852_v44 = vadd.f32 %v3243_v33, %v2657_v27  ;;  %v3245_v8 = vld [vmem:[#allocation17_spill] sm:$0xff] }
 0x153   : > { %1615 = vst [vmem:[%s2554_s17 + $0x1c0] sm:$0xff] %v1551_v17  ;;  %v1552_v50 = vmul.f32 %v1488_v55, %v1056_v58  ;;  %v904_v13 = vpop.f32.mrb[48].mxu1  ;;  %v745_v2 = vpop.f32.mrb[49].mxu0  ;;  %v1490_v7 = vmul.f32 %v1426_v34, %v1234_v42  ;;  %v2857_v51 = vadd.f32 %v3244_v60, %v2671_v19  ;;  %v2861_v57 = vadd.f32 %v3244_v60, %v2673_v37  ;;  %v3246_v37 = vld [vmem:[#allocation2_spill] sm:$0xff] }
 0x154   : > { %1617 = vst [vmem:[%s2554_s17 + $0x1d0] sm:$0xff] %v1553_v24  ;;  %v2865_v30 = vadd.f32 %v3244_v60, %v2687_v26  ;;  %v906_v22 = vpop.f32.mrb[49].mxu1  ;;  %v2870_v27 = vadd.f32 %v3244_v60, %v2689_v63  ;;  %v2874_v20 = vadd.f32 %v3245_v8, %v2701_v3  ;;  %v2878_v19 = vadd.f32 %v3245_v8, %v2708_v54  ;;  %v3247_v24 = vld [vmem:[#allocation4_spill] sm:$0xff] }
 0x155   : > { %1616 = vst [vmem:[%s2554_s17 + $0x1c8] sm:$0xff] %v1552_v50  ;;  %v1115_v45 = vadd.f32 %v3246_v37, %v743_v21  ;;  %v1554_v58 = vmul.f32 %v1490_v7, %v1058_v4  ;;  %v1117_v26 = vadd.f32 %v3246_v37, %v904_v13  ;;  %v1116_v6 = vadd.f32 %v3246_v37, %v745_v2 }
 0x156   : > { %v1118_v17 = vadd.f32 %v3246_v37, %v906_v22  ;;  %v749_v55 = vpop.f32.mrb[50].mxu0  ;;  %v2886_v63 = vadd.f32 %v3245_v8, %v2712_v12  ;;  %v2890_v3 = vadd.f32 %v3245_v8, %v2714_v59  ;;  %v2896_v33 = vadd.f32 %v2486_v14, %v2734_v15 }
 0x157   : > { %v1243_v54 = vmul.f32 0.70710677, %v1115_v45  ;;  %v1123_v42 = vadd.f32 %v3247_v24, %v749_v55  ;;  %v910_v34 = vpop.f32.mrb[50].mxu1  ;;  %v751_v4 = vpop.f32.mrb[51].mxu0  ;;  %1618 = vst [vmem:[%s2554_s17 + $0x1d8] sm:$0xff] %v1554_v58  ;;  %v2900_v21 = vadd.f32 %v2486_v14, %v2739_v35  ;;  %v2904_v59 = vadd.f32 %v2486_v14, %v2741_v9  ;;  %v3248_v58 = vld [vmem:[#allocation3_spill] sm:$0xff] }
 0x158   : > { %v1245_v12 = vmul.f32 0.70710677, %v1117_v26  ;;  %v1244_v50 = vmul.f32 0.70710677, %v1116_v6  ;;  %v2906_v13 = vmul.f32 0.5, %v1115_v45  ;;  %v912_v7 = vpop.f32.mrb[51].mxu1  ;;  %v1125_v15 = vadd.f32 %v3247_v24, %v910_v34 }
 0x159   : > { %1911 = verf.f32 %v1243_v54  ;;  %v1246_v2 = vmul.f32 0.70710677, %v1118_v17  ;;  %v1251_v60 = vmul.f32 0.70710677, %v1123_v42  ;;  %v1124_v22 = vadd.f32 %v3247_v24, %v751_v4 }
 0x15a   : > { %1913 = verf.f32 %v1245_v12  ;;  %v755_v8 = vpop.f32.mrb[52].mxu0  ;;  %v2910_v35 = vmul.f32 0.5, %v1117_v26  ;;  %v1126_v37 = vadd.f32 %v3247_v24, %v912_v7  ;;  %v2914_v38 = vmul.f32 0.5, %v1116_v6 }
 0x15b   : > { %1915 = verf.f32 %v1244_v50  ;;  %v1131_v9 = vadd.f32 %v3248_v58, %v755_v8  ;;  %v916_v55 = vpop.f32.mrb[52].mxu1  ;;  %v757_v45 = vpop.f32.mrb[53].mxu0  ;;  %v2916_v54 = vmul.f32 0.5, %v1118_v17  ;;  %v1253_v12 = vmul.f32 0.70710677, %v1125_v15 }
 0x15c   : > { %1917 = verf.f32 %v1246_v2  ;;  %v918_v62 = vpop.f32.mrb[53].mxu1  ;;  %v2918_v34 = vmul.f32 0.5, %v1123_v42  ;;  %v1252_v4 = vmul.f32 0.70710677, %v1124_v22  ;;  %v1254_v26 = vmul.f32 0.70710677, %v1126_v37 }
 0x15d   : > { %1919 = verf.f32 %v1251_v60  ;;  %v2920_v47 = vmul.f32 0.5, %v1125_v15  ;;  %v1259_v24 = vmul.f32 0.70710677, %v1131_v9  ;;  %v1133_v50 = vadd.f32 %v3248_v58, %v916_v55  ;;  %v3249_v2 = vld [vmem:[#allocation5_spill] sm:$0xff] }
 0x15e   : > { %1921 = verf.f32 %v1253_v12  ;;  %v761_v7 = vpop.f32.mrb[54].mxu0  ;;  %v1132_v6 = vadd.f32 %v3248_v58, %v757_v45  ;;  %v1134_v17 = vadd.f32 %v3248_v58, %v918_v62  ;;  %v2926_v10 = vmul.f32 0.5, %v1124_v22 }
 0x15f   : > { %1923 = verf.f32 %v1252_v4  ;;  %v1139_v8 = vadd.f32 %v3249_v2, %v761_v7  ;;  %v922_v16 = vpop.f32.mrb[54].mxu1  ;;  %v763_v42 = vpop.f32.mrb[55].mxu0  ;;  %v1261_v60 = vmul.f32 0.70710677, %v1133_v50  ;;  %v2929_v25 = vmul.f32 0.5, %v1126_v37 }
 0x160   : > { %1925 = verf.f32 %v1254_v26  ;;  %v1141_v15 = vadd.f32 %v3249_v2, %v922_v16  ;;  %v924_v12 = vpop.f32.mrb[55].mxu1  ;;  %v2931_v55 = vmul.f32 0.5, %v1131_v9  ;;  %v1260_v4 = vmul.f32 0.70710677, %v1132_v6 }
 0x161   : > { %1927 = verf.f32 %v1259_v24  ;;  %v2933_v45 = vmul.f32 0.5, %v1133_v50  ;;  %v1262_v62 = vmul.f32 0.70710677, %v1134_v17  ;;  %v1267_v58 = vmul.f32 0.70710677, %v1139_v8 }
 0x162   : > { %1929 = verf.f32 %v1261_v60  ;;  %v767_v7 = vpop.f32.mrb[56].mxu0  ;;  %v2935_v22 = vmul.f32 0.5, %v1132_v6  ;;  %v1269_v26 = vmul.f32 0.70710677, %v1141_v15  ;;  %v2938_v16 = vadd.f32 %v3249_v2, %v763_v42 }
 0x163   : > { %v1912_v1 = vpop.eup %1911  ;;  %1931 = verf.f32 %v1260_v4  ;;  %v928_v37 = vpop.f32.mrb[56].mxu1  ;;  %v2942_v31 = vmul.f32 0.5, %v1134_v17  ;;  %v2945_v50 = vadd.f32 %v3249_v2, %v924_v12  ;;  %v2949_v4 = vmul.f32 0.5, %v1139_v8 }
 0x164   : > { %v2940_v53 = vpop.f32.mrb[57].mxu0  ;;  %v1914_v9 = vpop.eup %1913  ;;  %v1371_v24 = vadd.f32 1.0, %v1912_v1  ;;  %1933 = verf.f32 %v1262_v62  ;;  %v1268_v42 = vmul.f32 0.70710677, %v2938_v16  ;;  %v2954_v1 = vadd.f32 %v2421_v41, %v767_v7 }
 0x165   : > { %v2947_v60 = vpop.f32.mrb[57].mxu1  ;;  %v1916_v6 = vpop.eup %1915  ;;  %v1373_v61 = vadd.f32 1.0, %v1914_v9  ;;  %1935 = verf.f32 %v1267_v58  ;;  %v1270_v8 = vmul.f32 0.70710677, %v2945_v50 }
 0x166   : > { %v1918_v40 = vpop.eup %1917  ;;  %v1435_v46 = vmul.f32 %v1371_v24, %v2906_v13  ;;  %v1372_v23 = vadd.f32 1.0, %v1916_v6  ;;  %1937 = verf.f32 %v1269_v26  ;;  %v2956_v17 = vpop.f32.mrb[58].mxu0  ;;  %v2966_v6 = vmul.f32 0.5, %v1141_v15 }
 0x167   : > { %v1920_v2 = vpop.eup %1919  ;;  %v1437_v12 = vmul.f32 %v1373_v61, %v2910_v35  ;;  %v1374_v62 = vadd.f32 1.0, %v1918_v40  ;;  %1939 = verf.f32 %v1268_v42  ;;  %v2960_v58 = vpop.f32.mrb[58].mxu1 }
 0x168   : > { %v2962_v9 = vpop.f32.mrb[59].mxu0  ;;  %v1922_v13 = vpop.eup %1921  ;;  %v1499_v26 = vmul.f32 %v1435_v46, %v2839_v0  ;;  %v1436_v7 = vmul.f32 %v1372_v23, %v2914_v38  ;;  %v1379_v24 = vadd.f32 1.0, %v1920_v2  ;;  %1941 = verf.f32 %v1270_v8 }
 0x169   : > { %v2968_v5 = vpop.f32.mrb[59].mxu1  ;;  %v1924_v40 = vpop.eup %1923  ;;  %v1501_v61 = vmul.f32 %v1437_v12, %v2844_v56  ;;  %v1438_v35 = vmul.f32 %v1374_v62, %v2916_v54  ;;  %v1381_v42 = vadd.f32 1.0, %v1922_v13  ;;  %v1275_v0 = vmul.f32 0.70710677, %v2954_v1 }
 0x16a   : > { %v1926_v28 = vpop.eup %1925  ;;  %1563 = vst [vmem:[%s2554_s17 + $0x20] sm:$0xff] %v1499_v26  ;;  %v1500_v46 = vmul.f32 %v1436_v7, %v2848_v29  ;;  %v1443_v23 = vmul.f32 %v1379_v24, %v2918_v34  ;;  %v1380_v38 = vadd.f32 1.0, %v1924_v40  ;;  %v2976_v15 = vpop.f32.mrb[60].mxu0  ;;  %v2982_v62 = vadd.f32 %v2421_v41, %v928_v37 }
 0x16b   : > { %v1928_v2 = vpop.eup %1927  ;;  %1565 = vst [vmem:[%s2554_s17 + $0x30] sm:$0xff] %v1501_v61  ;;  %v1502_v56 = vmul.f32 %v1438_v35, %v2852_v44  ;;  %v1445_v54 = vmul.f32 %v1381_v42, %v2920_v47  ;;  %v1382_v12 = vadd.f32 1.0, %v1926_v28  ;;  %v2984_v8 = vpop.f32.mrb[60].mxu1  ;;  %1943 = verf.f32 %v1275_v0 }
 0x16c   : > { %v2986_v29 = vpop.f32.mrb[61].mxu0  ;;  %v1930_v34 = vpop.eup %1929  ;;  %1564 = vst [vmem:[%s2554_s17 + $0x28] sm:$0xff] %v1500_v46  ;;  %v1507_v13 = vmul.f32 %v1443_v23, %v2857_v51  ;;  %v1444_v26 = vmul.f32 %v1380_v38, %v2926_v10  ;;  %v1387_v7 = vadd.f32 1.0, %v1928_v2  ;;  %v1204_v40 = vmul.f32 0.5, %v2938_v16 }
 0x16d   : > { %v2991_v44 = vpop.f32.mrb[61].mxu1  ;;  %v1932_v28 = vpop.eup %1931  ;;  %1566 = vst [vmem:[%s2554_s17 + $0x38] sm:$0xff] %v1502_v56  ;;  %v1509_v47 = vmul.f32 %v1445_v54, %v2861_v57  ;;  %v1446_v37 = vmul.f32 %v1382_v12, %v2929_v25  ;;  %v1389_v24 = vadd.f32 1.0, %v1930_v34  ;;  %v1277_v42 = vmul.f32 0.70710677, %v2982_v62 }
 0x16e   : > { %v1934_v61 = vpop.eup %1933  ;;  %1571 = vst [vmem:[%s2554_s17 + $0x60] sm:$0xff] %v1507_v13  ;;  %v1508_v51 = vmul.f32 %v1444_v26, %v2865_v30  ;;  %v1451_v10 = vmul.f32 %v1387_v7, %v2931_v55  ;;  %v1388_v35 = vadd.f32 1.0, %v1932_v28  ;;  %v3001_v46 = vpop.f32.mrb[62].mxu0  ;;  %v3008_v38 = vadd.f32 %v2421_v41, %v2940_v53 }
 0x16f   : > { %v1936_v23 = vpop.eup %1935  ;;  %1573 = vst [vmem:[%s2554_s17 + $0x70] sm:$0xff] %v1509_v47  ;;  %v1510_v25 = vmul.f32 %v1446_v37, %v2870_v27  ;;  %v1453_v57 = vmul.f32 %v1389_v24, %v2933_v45  ;;  %v1390_v16 = vadd.f32 1.0, %v1934_v61  ;;  %v3010_v30 = vpop.f32.mrb[62].mxu1  ;;  %1945 = verf.f32 %v1277_v42 }
 0x170   : > { %v3012_v55 = vpop.f32.mrb[63].mxu0  ;;  %v1938_v0 = vpop.eup %1937  ;;  %1572 = vst [vmem:[%s2554_s17 + $0x68] sm:$0xff] %v1508_v51  ;;  %v1515_v2 = vmul.f32 %v1451_v10, %v2874_v20  ;;  %v1452_v56 = vmul.f32 %v1388_v35, %v2935_v22  ;;  %v1395_v27 = vadd.f32 1.0, %v1936_v23  ;;  %v1206_v13 = vmul.f32 0.5, %v2945_v50 }
 0x171   : > { %v3017_v45 = vpop.f32.mrb[63].mxu1  ;;  %v1940_v54 = vpop.eup %1939  ;;  %1574 = vst [vmem:[%s2554_s17 + $0x78] sm:$0xff] %v1510_v25  ;;  %v1517_v53 = vmul.f32 %v1453_v57, %v2878_v19  ;;  %v1454_v12 = vmul.f32 %v1390_v16, %v2942_v31  ;;  %v1397_v34 = vadd.f32 1.0, %v1938_v0  ;;  %v1276_v7 = vmul.f32 0.70710677, %v3008_v38 }
 0x172   : > { %1579 = vst [vmem:[%s2554_s17 + $0xa0] sm:$0xff] %v1515_v2  ;;  %v1516_v20 = vmul.f32 %v1452_v56, %v2886_v63  ;;  %v1459_v22 = vmul.f32 %v1395_v27, %v2949_v4  ;;  %v1396_v26 = vadd.f32 1.0, %v1940_v54  ;;  %v1942_v28 = vpop.eup %1941  ;;  %v3032_v31 = vadd.f32 %v2421_v41, %v2947_v60 }
 0x173   : > { %1581 = vst [vmem:[%s2554_s17 + $0xb0] sm:$0xff] %v1517_v53  ;;  %v1518_v47 = vmul.f32 %v1454_v12, %v2890_v3  ;;  %v1461_v19 = vmul.f32 %v1397_v34, %v2966_v6  ;;  %v3036_v63 = vadd.f32 %v2425_v43, %v2956_v17  ;;  %v1398_v37 = vadd.f32 1.0, %v1942_v28  ;;  %v3250_v28 = vld [vmem:[#allocation20_spill] sm:$0xff] }
 0x174   : > { %1580 = vst [vmem:[%s2554_s17 + $0xa8] sm:$0xff] %v1516_v20  ;;  %v1523_v50 = vmul.f32 %v1459_v22, %v2896_v33  ;;  %v1460_v4 = vmul.f32 %v1396_v26, %v1204_v40  ;;  %1947 = verf.f32 %v1276_v7  ;;  %v1030_v3 = vadd.f32 %v2486_v14, %v2745_v36 }
 0x175   : > { %1582 = vst [vmem:[%s2554_s17 + $0xb8] sm:$0xff] %v1518_v47  ;;  %v1525_v6 = vmul.f32 %v1461_v19, %v2900_v21  ;;  %v1211_v41 = vmul.f32 0.5, %v2954_v1  ;;  %v1278_v60 = vmul.f32 0.70710677, %v3032_v31  ;;  %v1944_v17 = vpop.eup %1943  ;;  %v1462_v61 = vmul.f32 %v1398_v37, %v1206_v13  ;;  %v3251_v47 = vld [vmem:[#allocation18_spill] sm:$0xff] }
 0x176   : > { %1587 = vst [vmem:[%s2554_s17 + $0xe0] sm:$0xff] %v1523_v50  ;;  %v1524_v24 = vmul.f32 %v1460_v4, %v2904_v59  ;;  %v1283_v33 = vmul.f32 0.70710677, %v3036_v63  ;;  %v3051_v40 = vadd.f32 %v2425_v43, %v2960_v58  ;;  %v1403_v14 = vadd.f32 1.0, %v1944_v17 }
 0x177   : > { %1589 = vst [vmem:[%s2554_s17 + $0xf0] sm:$0xff] %v1525_v6  ;;  %1949 = verf.f32 %v1278_v60  ;;  %v3056_v36 = vadd.f32 %v2425_v43, %v2962_v9  ;;  %v3060_v21 = vadd.f32 %v2425_v43, %v2968_v5  ;;  %v1526_v59 = vmul.f32 %v1462_v61, %v1030_v3 }
 0x178   : > { %1588 = vst [vmem:[%s2554_s17 + $0xe8] sm:$0xff] %v1524_v24  ;;  %1951 = verf.f32 %v1283_v33  ;;  %v1285_v1 = vmul.f32 0.70710677, %v3051_v40  ;;  %v1035_v58 = vadd.f32 %v2629_v11, %v2753_v49  ;;  %v1467_v51 = vmul.f32 %v1403_v14, %v1211_v41 }
 0x179   : > { %v1213_v10 = vmul.f32 0.5, %v2982_v62  ;;  %v1284_v35 = vmul.f32 0.70710677, %v3056_v36  ;;  %v1946_v9 = vpop.eup %1945  ;;  %1590 = vst [vmem:[%s2554_s17 + $0xf8] sm:$0xff] %v1526_v59  ;;  %v1286_v43 = vmul.f32 0.70710677, %v3060_v21  ;;  %v3072_v5 = vadd.f32 %v2435_v48, %v2976_v15 }
 0x17a   : > { %1953 = verf.f32 %v1285_v1  ;;  %v3076_v42 = vadd.f32 %v2435_v48, %v2984_v8  ;;  %v1531_v49 = vmul.f32 %v1467_v51, %v1035_v58  ;;  %v1405_v23 = vadd.f32 1.0, %v1946_v9  ;;  %v3253_v1 = vld [vmem:[#allocation22_spill] sm:$0xff] }
 0x17b   : > { %1955 = verf.f32 %v1284_v35  ;;  %v3080_v62 = vadd.f32 %v2435_v48, %v2986_v29  ;;  %v1037_v25 = vadd.f32 %v2629_v11, %v2759_v39  ;;  %v1291_v57 = vmul.f32 0.70710677, %v3072_v5 }
 0x17c   : > { %1957 = verf.f32 %v1286_v43  ;;  %1595 = vst [vmem:[%s2554_s17 + $0x120] sm:$0xff] %v1531_v49  ;;  %v1469_v15 = vmul.f32 %v1405_v23, %v1213_v10  ;;  %v1212_v16 = vmul.f32 0.5, %v3008_v38  ;;  %v1293_v8 = vmul.f32 0.70710677, %v3076_v42  ;;  %v3255_v23 = vld [vmem:[#allocation7_spill] sm:$0xff] }
 0x17d   : > { %v1292_v0 = vmul.f32 0.70710677, %v3080_v62  ;;  %1959 = verf.f32 %v1291_v57  ;;  %v3091_v29 = vadd.f32 %v2435_v48, %v2991_v44  ;;  %v3095_v39 = vadd.f32 %v2443_v52, %v3001_v46 }
 0x17e   : > { %v1948_v2 = vpop.eup %1947  ;;  %v3099_v56 = vadd.f32 %v2443_v52, %v3010_v30  ;;  %v1533_v38 = vmul.f32 %v1469_v15, %v1037_v25  ;;  %1961 = verf.f32 %v1293_v8  ;;  %v3103_v54 = vadd.f32 %v2443_v52, %v3012_v55  ;;  %v3256_v25 = vld [vmem:[#allocation19_spill] sm:$0xff] }
 0x17f   : > { %v1404_v27 = vadd.f32 1.0, %v1948_v2  ;;  %v1036_v53 = vadd.f32 %v2629_v11, %v2761_v18  ;;  %v1038_v48 = vadd.f32 %v2629_v11, %v2764_v32  ;;  %1963 = verf.f32 %v1292_v0 }
 0x180   : > { %v1294_v44 = vmul.f32 0.70710677, %v3091_v29  ;;  %1597 = vst [vmem:[%s2554_s17 + $0x130] sm:$0xff] %v1533_v38  ;;  %v1214_v12 = vmul.f32 0.5, %v3032_v31  ;;  %v1299_v34 = vmul.f32 0.70710677, %v3095_v39  ;;  %v3118_v26 = vadd.f32 %v2443_v52, %v3017_v45 }
 0x181   : > { %v1950_v46 = vpop.eup %1949  ;;  %v1468_v30 = vmul.f32 %v1404_v27, %v1212_v16  ;;  %v1301_v13 = vmul.f32 0.70710677, %v3099_v56  ;;  %v1219_v18 = vmul.f32 0.5, %v3036_v63  ;;  %v1300_v11 = vmul.f32 0.70710677, %v3103_v54  ;;  %v3252_v31 = vld [vmem:[#allocation21_spill] sm:$0xff] }
 0x182   : > { %v1952_v55 = vpop.eup %1951  ;;  %v1406_v20 = vadd.f32 1.0, %v1950_v46  ;;  %1965 = verf.f32 %v1294_v44  ;;  %v1043_v19 = vadd.f32 %v3251_v47, %v3250_v28  ;;  %v1045_v50 = vadd.f32 %v3251_v47, %v3252_v31  ;;  %v3258_v44 = vld [vmem:[#allocation8_spill] sm:$0xff] }
 0x183   : > { %v1532_v32 = vmul.f32 %v1468_v30, %v1036_v53  ;;  %v1411_v22 = vadd.f32 1.0, %v1952_v55  ;;  %1967 = verf.f32 %v1299_v34  ;;  %v1221_v3 = vmul.f32 0.5, %v3051_v40  ;;  %v3254_v40 = vld [vmem:[#allocation6_spill] sm:$0xff] }
 0x184   : > { %v1954_v7 = vpop.eup %1953  ;;  %v1470_v4 = vmul.f32 %v1406_v20, %v1214_v12  ;;  %1969 = verf.f32 %v1301_v13  ;;  %v1220_v45 = vmul.f32 0.5, %v3056_v36  ;;  %v1302_v17 = vmul.f32 0.70710677, %v3118_v26  ;;  %v3259_v20 = vld [vmem:[#allocation24_spill] sm:$0xff] }
 0x185   : > { %v1956_v63 = vpop.eup %1955  ;;  %1596 = vst [vmem:[%s2554_s17 + $0x128] sm:$0xff] %v1532_v32  ;;  %v1475_v37 = vmul.f32 %v1411_v22, %v1219_v18  ;;  %v1413_v6 = vadd.f32 1.0, %v1954_v7  ;;  %1971 = verf.f32 %v1300_v11  ;;  %v1222_v33 = vmul.f32 0.5, %v3060_v21 }
 0x186   : > { %v1958_v41 = vpop.eup %1957  ;;  %v1534_v52 = vmul.f32 %v1470_v4, %v1038_v48  ;;  %v1412_v60 = vadd.f32 1.0, %v1956_v63  ;;  %v1044_v58 = vadd.f32 %v3251_v47, %v3253_v1  ;;  %v1046_v51 = vadd.f32 %v3251_v47, %v3254_v40  ;;  %v3257_v48 = vld [vmem:[#allocation9_spill] sm:$0xff] }
 0x187   : > { %v1539_v24 = vmul.f32 %v1475_v37, %v1043_v19  ;;  %v1477_v61 = vmul.f32 %v1413_v6, %v1221_v3  ;;  %v1414_v14 = vadd.f32 1.0, %v1958_v41  ;;  %v1960_v59 = vpop.eup %1959  ;;  %1973 = verf.f32 %v1302_v17  ;;  %v3262_v6 = vld [vmem:[#allocation11_spill] sm:$0xff] }
 0x188   : > { %1598 = vst [vmem:[%s2554_s17 + $0x138] sm:$0xff] %v1534_v52  ;;  %v1476_v10 = vmul.f32 %v1412_v60, %v1220_v45  ;;  %v1962_v36 = vpop.eup %1961  ;;  %v1227_v43 = vmul.f32 0.5, %v3072_v5  ;;  %v1419_v21 = vadd.f32 1.0, %v1960_v59  ;;  %v1051_v57 = vadd.f32 %v3256_v25, %v3255_v23  ;;  %v3263_v45 = vld [vmem:[#allocation25_spill] sm:$0xff]  ;;  %v3264_v59 = vld [vmem:[#allocation12_spill] sm:$0xff] }
 0x189   : > { %1603 = vst [vmem:[%s2554_s17 + $0x160] sm:$0xff] %v1539_v24  ;;  %v1541_v35 = vmul.f32 %v1477_v61, %v1045_v50  ;;  %v1478_v9 = vmul.f32 %v1414_v14, %v1222_v33  ;;  %v1964_v49 = vpop.eup %1963  ;;  %v1229_v16 = vmul.f32 0.5, %v3076_v42  ;;  %v1421_v8 = vadd.f32 1.0, %v1962_v36  ;;  %v3260_v50 = vld [vmem:[#allocation10_spill] sm:$0xff] }
 0x18a   : > { %v1540_v15 = vmul.f32 %v1476_v10, %v1044_v58  ;;  %v1483_v2 = vmul.f32 %v1419_v21, %v1227_v43  ;;  %v1228_v38 = vmul.f32 0.5, %v3080_v62  ;;  %v1420_v27 = vadd.f32 1.0, %v1964_v49 }
 0x18b   : > { %1605 = vst [vmem:[%s2554_s17 + $0x170] sm:$0xff] %v1541_v35  ;;  %v1542_v0 = vmul.f32 %v1478_v9, %v1046_v51  ;;  %v1053_v5 = vadd.f32 %v3256_v25, %v3257_v48  ;;  %v1052_v46 = vadd.f32 %v3256_v25, %v3258_v44  ;;  %v1485_v30 = vmul.f32 %v1421_v8, %v1229_v16 }
 0x18c   : > { %v1966_v53 = vpop.eup %1965  ;;  %1604 = vst [vmem:[%s2554_s17 + $0x168] sm:$0xff] %v1540_v15  ;;  %v1547_v42 = vmul.f32 %v1483_v2, %v1051_v57  ;;  %v1484_v34 = vmul.f32 %v1420_v27, %v1228_v38  ;;  %v1230_v13 = vmul.f32 0.5, %v3091_v29  ;;  %v1054_v18 = vadd.f32 %v3256_v25, %v3259_v20  ;;  %v3261_v29 = vld [vmem:[#allocation23_spill] sm:$0xff] }
 0x18d   : > { %v1968_v12 = vpop.eup %1967  ;;  %1606 = vst [vmem:[%s2554_s17 + $0x178] sm:$0xff] %v1542_v0  ;;  %v1422_v55 = vadd.f32 1.0, %v1966_v53  ;;  %v1549_v11 = vmul.f32 %v1485_v30, %v1053_v5  ;;  %v1235_v32 = vmul.f32 0.5, %v3095_v39  ;;  %v1237_v19 = vmul.f32 0.5, %v3099_v56 }
 0x18e   : > { %v1970_v62 = vpop.eup %1969  ;;  %v1427_v22 = vadd.f32 1.0, %v1968_v12  ;;  %1611 = vst [vmem:[%s2554_s17 + $0x1a0] sm:$0xff] %v1547_v42  ;;  %v1548_v28 = vmul.f32 %v1484_v34, %v1052_v46  ;;  %v1059_v4 = vadd.f32 %v3261_v29, %v3260_v50  ;;  %v1236_v37 = vmul.f32 0.5, %v3103_v54 }
 0x18f   : > { %v1972_v7 = vpop.eup %1971  ;;  %v1486_v47 = vmul.f32 %v1422_v55, %v1230_v13  ;;  %v1429_v31 = vadd.f32 1.0, %v1970_v62  ;;  %1613 = vst [vmem:[%s2554_s17 + $0x1b0] sm:$0xff] %v1549_v11  ;;  %v1061_v39 = vadd.f32 %v3261_v29, %v3262_v6  ;;  %v1060_v60 = vadd.f32 %v3261_v29, %v3263_v45 }
 0x190   : > { %v1491_v63 = vmul.f32 %v1427_v22, %v1235_v32  ;;  %v1428_v3 = vadd.f32 1.0, %v1972_v7  ;;  %1612 = vst [vmem:[%s2554_s17 + $0x1a8] sm:$0xff] %v1548_v28  ;;  %v1238_v54 = vmul.f32 0.5, %v3118_v26  ;;  %v1062_v1 = vadd.f32 %v3261_v29, %v3264_v59 }
 0x191   : > { %v1550_v41 = vmul.f32 %v1486_v47, %v1054_v18  ;;  %v1493_v52 = vmul.f32 %v1429_v31, %v1237_v19  ;;  %v1974_v56 = vpop.eup %1973 }
 0x192   : > { %v1555_v17 = vmul.f32 %v1491_v63, %v1059_v4  ;;  %v1492_v24 = vmul.f32 %v1428_v3, %v1236_v37  ;;  %v1430_v33 = vadd.f32 1.0, %v1974_v56 }
 0x193   : > { %1614 = vst [vmem:[%s2554_s17 + $0x1b8] sm:$0xff] %v1550_v41  ;;  %v1557_v61 = vmul.f32 %v1493_v52, %v1061_v39 }
 0x194   : > { %1619 = vst [vmem:[%s2554_s17 + $0x1e0] sm:$0xff] %v1555_v17  ;;  %v1556_v14 = vmul.f32 %v1492_v24, %v1060_v60  ;;  %v1494_v58 = vmul.f32 %v1430_v33, %v1238_v54 }
 0x195   : > { %1621 = vst [vmem:[%s2554_s17 + $0x1f0] sm:$0xff] %v1557_v61 }
 0x196   : > { %1620 = vst [vmem:[%s2554_s17 + $0x1e8] sm:$0xff] %v1556_v14  ;;  %v1558_v40 = vmul.f32 %v1494_v58, %v1062_v1 }
 0x198   : > { %1622 = vst [vmem:[%s2554_s17 + $0x1f8] sm:$0xff] %v1558_v40 }
 0x199 PF: > { %s13_s14 = sadd.s32 1, %s1997_s14   ;;  %s3265_s12 = smov %s1993_s13 }
 0x19a   : > { %p10_p5 = scmp.ge.s32.totalorder %s13_s14, 4   ;;  %s3266_s13 = smov %s3268_s15 }
 0x19c   :  { %12 = sbr.rel (!%p10_p5) target bundleno = 2 (0x2), region = 62 }

</bundles_post_ra>
